<compile_context>
chip_gen: v5e
topology: v5e:2x2
jax: 0.10.0
libtpu: 0.0.40
codegen_flags: <defaults>
</compile_context>

<pallas_src>
import functools

import jax
import jax.numpy as jnp
from jax.experimental import pallas as pl
from jax.experimental.pallas import tpu as pltpu


# ----------------------------------------------------------------------------
# Single fused kernel: LSTM encoder + masked max-pool + MLP head + softmax +
# AUCM loss.  No grid — everything fits comfortably in VMEM at these sizes.
# ----------------------------------------------------------------------------
def fused_learner_kernel(x2d_ref, lens_ref, y_ref,
                         wih_ref, whh_ref, bg_ref,
                         w1_ref, b1_ref, w2_ref, b2_ref, aba_ref,
                         logits_ref, probs_ref, loss_ref,
                         *, T, B, H):
    # --- hoisted input projection: one (T*B, D) x (D, 4H) MXU matmul ---
    gates_x = jnp.dot(x2d_ref[...], wih_ref[...],
                      preferred_element_type=jnp.float32) + bg_ref[...]  # (T*B, 4H) f32
    whh = whh_ref[...]                     # (H, 4H) bf16, stays resident
    lens = lens_ref[...]                   # (B, 1) int32

    h = jnp.zeros((B, H), jnp.float32)
    c = jnp.zeros((B, H), jnp.float32)
    # Finite sentinel instead of -inf: an (impossible after len clamp) all-pad
    # column saturates instead of producing NaN through tanh / the classifier.
    pool = jnp.full((B, H), -3.0e38, jnp.float32)

    # Fully unrolled static time loop; only h @ W_hh sits on the serial path.
    for t in range(T):
        g = gates_x[t * B:(t + 1) * B, :] + jnp.dot(
            h.astype(whh.dtype), whh, preferred_element_type=jnp.float32)   # (B, 4H)
        # NOTE: at H=32 these slices split a 128-lane vreg (XLU shuffles with
        # plenty of slack); when scaling, keep H a multiple of 128.
        i_g = jax.nn.sigmoid(g[:, 0 * H:1 * H])
        f_g = jax.nn.sigmoid(g[:, 1 * H:2 * H])
        g_g = jnp.tanh(g[:, 2 * H:3 * H])
        o_g = jax.nn.sigmoid(g[:, 3 * H:4 * H])

        c_new = f_g * c + i_g * g_g
        h_new = o_g * jnp.tanh(c_new)

        valid = lens > t                   # (B,1) bool, packed-seq semantics
        c = jnp.where(valid, c_new, c)
        h = jnp.where(valid, h_new, h)
        pool = jnp.where(valid, jnp.maximum(pool, h_new), pool)

    # --- classifier head: Linear -> tanh -> Linear ---
    w1 = w1_ref[...]
    w2 = w2_ref[...]
    hid = jnp.tanh(jnp.dot(pool.astype(w1.dtype), w1,
                           preferred_element_type=jnp.float32) + b1_ref[...])  # (B, FC)
    logits = jnp.dot(hid.astype(w2.dtype), w2,
                     preferred_element_type=jnp.float32) + b2_ref[...]         # (B, C)
    logits_ref[...] = logits

    # softmax(dim=1)
    m = jnp.max(logits, axis=-1, keepdims=True)
    e = jnp.exp(logits - m)
    probs = e / jnp.sum(e, axis=-1, keepdims=True)
    probs_ref[...] = probs

    # AUCM loss on the positive-class probability softmax(...)[:, -1].
    C = logits.shape[-1]
    pred = probs[:, C - 1:C]                                  # (B, 1)
    y = y_ref[...]                                            # (B, 1) float {0,1}
    a = aba_ref[0, 0]
    b = aba_ref[0, 1]
    alpha = aba_ref[0, 2]
    p = jnp.mean(y)                                           # per-batch imratio
    pos = y
    neg = 1.0 - y
    loss = ((1.0 - p) * jnp.mean((pred - a) ** 2 * pos)
            + p * jnp.mean((pred - b) ** 2 * neg)
            + 2.0 * alpha * (p * (1.0 - p)
                             + jnp.mean(p * pred * neg - (1.0 - p) * pred * pos))
            - p * (1.0 - p) * alpha ** 2)
    loss_ref[0, 0] = loss


# ----------------------------------------------------------------------------
# Plain-JAX glue: pairwise (Mann-Whitney) AUC, replacing sklearn roc_auc_score.
# Kept outside the kernel (tiny (B,B) XLA fusion; the pairwise matrix needs a
# transpose that is not worth the in-kernel lowering risk at these sizes).
# ----------------------------------------------------------------------------
def pairwise_auc(scores, labels):
    pos = (labels == 1)[:, None]
    neg = (labels == 0)[None, :]
    w = (pos & neg).astype(jnp.float32)
    gt = (scores[:, None] > scores[None, :]).astype(jnp.float32)
    eq = (scores[:, None] == scores[None, :]).astype(jnp.float32)
    return jnp.sum(w * (gt + 0.5 * eq)) / jnp.maximum(jnp.sum(w), 1.0)


@jax.jit
def learner_eval_step(x, lens, labels, params):
    T, B, D = x.shape
    H = params["whh"].shape[0]
    C = params["w2"].shape[1]

    # collate_pad_ forces length >= 1 for empty sentences; mirror that here.
    lens_col = jnp.maximum(lens, 1).astype(jnp.int32).reshape(B, 1)
    y_col = labels.astype(jnp.float32).reshape(B, 1)
    # Free host-side reshape (contiguous) so the kernel needs no reshape.
    x2d = x.reshape(T * B, D).astype(jnp.bfloat16)

    kernel = functools.partial(fused_learner_kernel, T=T, B=B, H=H)
    vmem = pltpu.MemorySpace.VMEM
    smem = pltpu.MemorySpace.SMEM

    logits, probs, loss = pl.pallas_call(
        kernel,
        out_shape=(jax.ShapeDtypeStruct((B, C), jnp.float32),
                   jax.ShapeDtypeStruct((B, C), jnp.float32),
                   jax.ShapeDtypeStruct((1, 1), jnp.float32)),
        in_specs=[pl.BlockSpec(memory_space=vmem)] * 10
                 + [pl.BlockSpec(memory_space=smem)],
        out_specs=(pl.BlockSpec(memory_space=vmem),
                   pl.BlockSpec(memory_space=vmem),
                   pl.BlockSpec(memory_space=smem)),
    )(
        x2d,
        lens_col,
        y_col,
        params["wih"].astype(jnp.bfloat16),   # bf16 MXU operands, f32 accum
        params["whh"].astype(jnp.bfloat16),
        params["bg"],
        params["w1"].astype(jnp.bfloat16),
        params["b1"],
        params["w2"].astype(jnp.bfloat16),
        params["b2"],
        params["aba"],
    )

    auc = pairwise_auc(probs[:, -1], labels)
    return logits, probs, loss[0, 0], auc


if __name__ == "__main__":
    # Small synthetic shapes implied by the module's forward.
    T, B, D, H, FC, C = 8, 8, 32, 32, 32, 2

    key = jax.random.PRNGKey(0)
    ks = jax.random.split(key, 8)
    k = 1.0 / jnp.sqrt(jnp.float32(H))

    params = {
        # LSTM: W_ih (D, 4H), W_hh (H, 4H), combined bias (1, 4H)  [i, f, g, o]
        "wih": jax.random.uniform(ks[0], (D, 4 * H), jnp.float32, -k, k),
        "whh": jax.random.uniform(ks[1], (H, 4 * H), jnp.float32, -k, k),
        "bg":  jax.random.uniform(ks[2], (1, 4 * H), jnp.float32, -k, k),
        # classifier: Linear(H, FC) -> tanh -> Linear(FC, C)
        "w1":  jax.random.uniform(ks[3], (H, FC), jnp.float32, -k, k),
        "b1":  jax.random.uniform(ks[4], (1, FC), jnp.float32, -k, k),
        "w2":  jax.random.uniform(ks[5], (FC, C), jnp.float32, -k, k),
        "b2":  jax.random.uniform(ks[6], (1, C), jnp.float32, -k, k),
        # (a, b, alpha) initialized to zero, as in Learner.__init__
        "aba": jnp.zeros((1, 3), jnp.float32),
    }

    # Inputs: time-major padded embeddings (T, B, D), lengths, binary labels.
    x = jax.random.normal(ks[7], (T, B, D), jnp.float32)
    lens = jnp.array([8, 5, 8, 3, 8, 8, 2, 8], jnp.int32)
    labels = jnp.array([0, 1, 0, 1, 1, 0, 1, 0], jnp.int32)

    logits, probs, loss, auc = learner_eval_step(x, lens, labels, params)
    jax.block_until_ready((logits, probs, loss, auc))

    assert logits.shape == (B, C) and probs.shape == (B, C)
    assert bool(jnp.all(jnp.isfinite(logits))) and bool(jnp.all(jnp.isfinite(probs)))
    assert bool(jnp.isfinite(loss)) and bool(jnp.isfinite(auc))
    print("KERNEL_OK")
</pallas_src>

<mosaic_0001>
module attributes {stable_mosaic.version = 11 : i64} {
  func.func @fused_learner_kernel(%arg0: memref<64x32xbf16, #tpu.memory_space<vmem>>, %arg1: memref<8x1xi32, #tpu.memory_space<vmem>>, %arg2: memref<8x1xf32, #tpu.memory_space<vmem>>, %arg3: memref<32x128xbf16, #tpu.memory_space<vmem>>, %arg4: memref<32x128xbf16, #tpu.memory_space<vmem>>, %arg5: memref<1x128xf32, #tpu.memory_space<vmem>>, %arg6: memref<32x32xbf16, #tpu.memory_space<vmem>>, %arg7: memref<1x32xf32, #tpu.memory_space<vmem>>, %arg8: memref<32x2xbf16, #tpu.memory_space<vmem>>, %arg9: memref<1x2xf32, #tpu.memory_space<vmem>>, %arg10: memref<1x3xf32, #tpu.memory_space<smem>>, %arg11: memref<8x2xf32, #tpu.memory_space<vmem>>, %arg12: memref<8x2xf32, #tpu.memory_space<vmem>>, %arg13: memref<1x1xf32, #tpu.memory_space<smem>>) attributes {dimension_semantics = [], scalar_prefetch = 0 : i64, scratch_operands = 0 : i64, tpu.core_type = #tpu.core_type<tc>} {
    %c0 = arith.constant 0 : index
    %c0_0 = arith.constant 0 : index
    %0 = vector.load %arg0[%c0, %c0_0] : memref<64x32xbf16, #tpu.memory_space<vmem>>, vector<64x32xbf16>
    %c0_1 = arith.constant 0 : index
    %c0_2 = arith.constant 0 : index
    %1 = vector.load %arg3[%c0_1, %c0_2] : memref<32x128xbf16, #tpu.memory_space<vmem>>, vector<32x128xbf16>
    %cst = arith.constant dense<0.000000e+00> : vector<64x128xf32>
    %2 = tpu.matmul %0, %1, %cst {dimension_numbers = #tpu.dot_dimension_numbers<[1], [0], [0], [1], [0, 0, 1, 1], [], []>} : vector<64x32xbf16>, vector<32x128xbf16>, vector<64x128xf32> -> vector<64x128xf32>
    %c0_3 = arith.constant 0 : index
    %c0_4 = arith.constant 0 : index
    %3 = vector.load %arg5[%c0_3, %c0_4] : memref<1x128xf32, #tpu.memory_space<vmem>>, vector<1x128xf32>
    %4 = vector.broadcast %3 : vector<1x128xf32> to vector<64x128xf32>
    %5 = arith.addf %2, %4 : vector<64x128xf32>
    %c0_5 = arith.constant 0 : index
    %c0_6 = arith.constant 0 : index
    %6 = vector.load %arg4[%c0_5, %c0_6] : memref<32x128xbf16, #tpu.memory_space<vmem>>, vector<32x128xbf16>
    %c0_7 = arith.constant 0 : index
    %c0_8 = arith.constant 0 : index
    %7 = vector.load %arg1[%c0_7, %c0_8] : memref<8x1xi32, #tpu.memory_space<vmem>>, vector<8x1xi32>
    %cst_9 = arith.constant 0.000000e+00 : f32
    %8 = vector.broadcast %cst_9 : f32 to vector<8x32xf32>
    %cst_10 = arith.constant 0.000000e+00 : f32
    %9 = vector.broadcast %cst_10 : f32 to vector<8x32xf32>
    %cst_11 = arith.constant -3.000000e+38 : f32
    %10 = vector.broadcast %cst_11 : f32 to vector<8x32xf32>
    %11 = vector.extract_strided_slice %5 {offsets = [0, 0], sizes = [8, 128], strides = [1, 1]} : vector<64x128xf32> to vector<8x128xf32>
    %12 = arith.truncf %8 : vector<8x32xf32> to vector<8x32xbf16>
    %cst_12 = arith.constant dense<0.000000e+00> : vector<8x128xf32>
    %13 = tpu.matmul %12, %6, %cst_12 {dimension_numbers = #tpu.dot_dimension_numbers<[1], [0], [0], [1], [0, 0, 1, 1], [], []>} : vector<8x32xbf16>, vector<32x128xbf16>, vector<8x128xf32> -> vector<8x128xf32>
    %14 = arith.addf %11, %13 : vector<8x128xf32>
    %15 = vector.extract_strided_slice %14 {offsets = [0, 0], sizes = [8, 32], strides = [1, 1]} : vector<8x128xf32> to vector<8x32xf32>
    %16 = arith.negf %15 : vector<8x32xf32>
    %17 = math.exp %16 : vector<8x32xf32>
    %cst_13 = arith.constant 1.000000e+00 : f32
    %18 = vector.broadcast %cst_13 : f32 to vector<8x32xf32>
    %19 = arith.addf %18, %17 : vector<8x32xf32>
    %20 = arith.divf %18, %19 : vector<8x32xf32>
    %21 = vector.extract_strided_slice %14 {offsets = [0, 32], sizes = [8, 32], strides = [1, 1]} : vector<8x128xf32> to vector<8x32xf32>
    %22 = arith.negf %21 : vector<8x32xf32>
    %23 = math.exp %22 : vector<8x32xf32>
    %cst_14 = arith.constant 1.000000e+00 : f32
    %24 = vector.broadcast %cst_14 : f32 to vector<8x32xf32>
    %25 = arith.addf %24, %23 : vector<8x32xf32>
    %26 = arith.divf %24, %25 : vector<8x32xf32>
    %27 = vector.extract_strided_slice %14 {offsets = [0, 64], sizes = [8, 32], strides = [1, 1]} : vector<8x128xf32> to vector<8x32xf32>
    %28 = math.tanh %27 : vector<8x32xf32>
    %29 = vector.extract_strided_slice %14 {offsets = [0, 96], sizes = [8, 32], strides = [1, 1]} : vector<8x128xf32> to vector<8x32xf32>
    %30 = arith.negf %29 : vector<8x32xf32>
    %31 = math.exp %30 : vector<8x32xf32>
    %cst_15 = arith.constant 1.000000e+00 : f32
    %32 = vector.broadcast %cst_15 : f32 to vector<8x32xf32>
    %33 = arith.addf %32, %31 : vector<8x32xf32>
    %34 = arith.divf %32, %33 : vector<8x32xf32>
    %35 = arith.mulf %26, %9 : vector<8x32xf32>
    %36 = arith.mulf %20, %28 : vector<8x32xf32>
    %37 = arith.addf %35, %36 : vector<8x32xf32>
    %38 = math.tanh %37 : vector<8x32xf32>
    %39 = arith.mulf %34, %38 : vector<8x32xf32>
    %c0_i32 = arith.constant 0 : i32
    %40 = vector.broadcast %c0_i32 : i32 to vector<8x1xi32>
    %41 = arith.cmpi sgt, %7, %40 : vector<8x1xi32>
    %42 = vector.shape_cast %41 : vector<8x1xi1> to vector<8x1xi1>
    %43 = vector.broadcast %42 : vector<8x1xi1> to vector<8x32xi1>
    %44 = arith.select %43, %37, %9 : vector<8x32xi1>, vector<8x32xf32>
    %45 = vector.shape_cast %41 : vector<8x1xi1> to vector<8x1xi1>
    %46 = vector.broadcast %45 : vector<8x1xi1> to vector<8x32xi1>
    %47 = arith.select %46, %39, %8 : vector<8x32xi1>, vector<8x32xf32>
    %48 = arith.maximumf %10, %39 : vector<8x32xf32>
    %49 = vector.shape_cast %41 : vector<8x1xi1> to vector<8x1xi1>
    %50 = vector.broadcast %49 : vector<8x1xi1> to vector<8x32xi1>
    %51 = arith.select %50, %48, %10 : vector<8x32xi1>, vector<8x32xf32>
    %52 = vector.extract_strided_slice %5 {offsets = [8, 0], sizes = [8, 128], strides = [1, 1]} : vector<64x128xf32> to vector<8x128xf32>
    %53 = arith.truncf %47 : vector<8x32xf32> to vector<8x32xbf16>
    %cst_16 = arith.constant dense<0.000000e+00> : vector<8x128xf32>
    %54 = tpu.matmul %53, %6, %cst_16 {dimension_numbers = #tpu.dot_dimension_numbers<[1], [0], [0], [1], [0, 0, 1, 1], [], []>} : vector<8x32xbf16>, vector<32x128xbf16>, vector<8x128xf32> -> vector<8x128xf32>
    %55 = arith.addf %52, %54 : vector<8x128xf32>
    %56 = vector.extract_strided_slice %55 {offsets = [0, 0], sizes = [8, 32], strides = [1, 1]} : vector<8x128xf32> to vector<8x32xf32>
    %57 = arith.negf %56 : vector<8x32xf32>
    %58 = math.exp %57 : vector<8x32xf32>
    %cst_17 = arith.constant 1.000000e+00 : f32
    %59 = vector.broadcast %cst_17 : f32 to vector<8x32xf32>
    %60 = arith.addf %59, %58 : vector<8x32xf32>
    %61 = arith.divf %59, %60 : vector<8x32xf32>
    %62 = vector.extract_strided_slice %55 {offsets = [0, 32], sizes = [8, 32], strides = [1, 1]} : vector<8x128xf32> to vector<8x32xf32>
    %63 = arith.negf %62 : vector<8x32xf32>
    %64 = math.exp %63 : vector<8x32xf32>
    %cst_18 = arith.constant 1.000000e+00 : f32
    %65 = vector.broadcast %cst_18 : f32 to vector<8x32xf32>
    %66 = arith.addf %65, %64 : vector<8x32xf32>
    %67 = arith.divf %65, %66 : vector<8x32xf32>
    %68 = vector.extract_strided_slice %55 {offsets = [0, 64], sizes = [8, 32], strides = [1, 1]} : vector<8x128xf32> to vector<8x32xf32>
    %69 = math.tanh %68 : vector<8x32xf32>
    %70 = vector.extract_strided_slice %55 {offsets = [0, 96], sizes = [8, 32], strides = [1, 1]} : vector<8x128xf32> to vector<8x32xf32>
    %71 = arith.negf %70 : vector<8x32xf32>
    %72 = math.exp %71 : vector<8x32xf32>
    %cst_19 = arith.constant 1.000000e+00 : f32
    %73 = vector.broadcast %cst_19 : f32 to vector<8x32xf32>
    %74 = arith.addf %73, %72 : vector<8x32xf32>
    %75 = arith.divf %73, %74 : vector<8x32xf32>
    %76 = arith.mulf %67, %44 : vector<8x32xf32>
    %77 = arith.mulf %61, %69 : vector<8x32xf32>
    %78 = arith.addf %76, %77 : vector<8x32xf32>
    %79 = math.tanh %78 : vector<8x32xf32>
    %80 = arith.mulf %75, %79 : vector<8x32xf32>
    %c1_i32 = arith.constant 1 : i32
    %81 = vector.broadcast %c1_i32 : i32 to vector<8x1xi32>
    %82 = arith.cmpi sgt, %7, %81 : vector<8x1xi32>
    %83 = vector.shape_cast %82 : vector<8x1xi1> to vector<8x1xi1>
    %84 = vector.broadcast %83 : vector<8x1xi1> to vector<8x32xi1>
    %85 = arith.select %84, %78, %44 : vector<8x32xi1>, vector<8x32xf32>
    %86 = vector.shape_cast %82 : vector<8x1xi1> to vector<8x1xi1>
    %87 = vector.broadcast %86 : vector<8x1xi1> to vector<8x32xi1>
    %88 = arith.select %87, %80, %47 : vector<8x32xi1>, vector<8x32xf32>
    %89 = arith.maximumf %51, %80 : vector<8x32xf32>
    %90 = vector.shape_cast %82 : vector<8x1xi1> to vector<8x1xi1>
    %91 = vector.broadcast %90 : vector<8x1xi1> to vector<8x32xi1>
    %92 = arith.select %91, %89, %51 : vector<8x32xi1>, vector<8x32xf32>
    %93 = vector.extract_strided_slice %5 {offsets = [16, 0], sizes = [8, 128], strides = [1, 1]} : vector<64x128xf32> to vector<8x128xf32>
    %94 = arith.truncf %88 : vector<8x32xf32> to vector<8x32xbf16>
    %cst_20 = arith.constant dense<0.000000e+00> : vector<8x128xf32>
    %95 = tpu.matmul %94, %6, %cst_20 {dimension_numbers = #tpu.dot_dimension_numbers<[1], [0], [0], [1], [0, 0, 1, 1], [], []>} : vector<8x32xbf16>, vector<32x128xbf16>, vector<8x128xf32> -> vector<8x128xf32>
    %96 = arith.addf %93, %95 : vector<8x128xf32>
    %97 = vector.extract_strided_slice %96 {offsets = [0, 0], sizes = [8, 32], strides = [1, 1]} : vector<8x128xf32> to vector<8x32xf32>
    %98 = arith.negf %97 : vector<8x32xf32>
    %99 = math.exp %98 : vector<8x32xf32>
    %cst_21 = arith.constant 1.000000e+00 : f32
    %100 = vector.broadcast %cst_21 : f32 to vector<8x32xf32>
    %101 = arith.addf %100, %99 : vector<8x32xf32>
    %102 = arith.divf %100, %101 : vector<8x32xf32>
    %103 = vector.extract_strided_slice %96 {offsets = [0, 32], sizes = [8, 32], strides = [1, 1]} : vector<8x128xf32> to vector<8x32xf32>
    %104 = arith.negf %103 : vector<8x32xf32>
    %105 = math.exp %104 : vector<8x32xf32>
    %cst_22 = arith.constant 1.000000e+00 : f32
    %106 = vector.broadcast %cst_22 : f32 to vector<8x32xf32>
    %107 = arith.addf %106, %105 : vector<8x32xf32>
    %108 = arith.divf %106, %107 : vector<8x32xf32>
    %109 = vector.extract_strided_slice %96 {offsets = [0, 64], sizes = [8, 32], strides = [1, 1]} : vector<8x128xf32> to vector<8x32xf32>
    %110 = math.tanh %109 : vector<8x32xf32>
    %111 = vector.extract_strided_slice %96 {offsets = [0, 96], sizes = [8, 32], strides = [1, 1]} : vector<8x128xf32> to vector<8x32xf32>
    %112 = arith.negf %111 : vector<8x32xf32>
    %113 = math.exp %112 : vector<8x32xf32>
    %cst_23 = arith.constant 1.000000e+00 : f32
    %114 = vector.broadcast %cst_23 : f32 to vector<8x32xf32>
    %115 = arith.addf %114, %113 : vector<8x32xf32>
    %116 = arith.divf %114, %115 : vector<8x32xf32>
    %117 = arith.mulf %108, %85 : vector<8x32xf32>
    %118 = arith.mulf %102, %110 : vector<8x32xf32>
    %119 = arith.addf %117, %118 : vector<8x32xf32>
    %120 = math.tanh %119 : vector<8x32xf32>
    %121 = arith.mulf %116, %120 : vector<8x32xf32>
    %c2_i32 = arith.constant 2 : i32
    %122 = vector.broadcast %c2_i32 : i32 to vector<8x1xi32>
    %123 = arith.cmpi sgt, %7, %122 : vector<8x1xi32>
    %124 = vector.shape_cast %123 : vector<8x1xi1> to vector<8x1xi1>
    %125 = vector.broadcast %124 : vector<8x1xi1> to vector<8x32xi1>
    %126 = arith.select %125, %119, %85 : vector<8x32xi1>, vector<8x32xf32>
    %127 = vector.shape_cast %123 : vector<8x1xi1> to vector<8x1xi1>
    %128 = vector.broadcast %127 : vector<8x1xi1> to vector<8x32xi1>
    %129 = arith.select %128, %121, %88 : vector<8x32xi1>, vector<8x32xf32>
    %130 = arith.maximumf %92, %121 : vector<8x32xf32>
    %131 = vector.shape_cast %123 : vector<8x1xi1> to vector<8x1xi1>
    %132 = vector.broadcast %131 : vector<8x1xi1> to vector<8x32xi1>
    %133 = arith.select %132, %130, %92 : vector<8x32xi1>, vector<8x32xf32>
    %134 = vector.extract_strided_slice %5 {offsets = [24, 0], sizes = [8, 128], strides = [1, 1]} : vector<64x128xf32> to vector<8x128xf32>
    %135 = arith.truncf %129 : vector<8x32xf32> to vector<8x32xbf16>
    %cst_24 = arith.constant dense<0.000000e+00> : vector<8x128xf32>
    %136 = tpu.matmul %135, %6, %cst_24 {dimension_numbers = #tpu.dot_dimension_numbers<[1], [0], [0], [1], [0, 0, 1, 1], [], []>} : vector<8x32xbf16>, vector<32x128xbf16>, vector<8x128xf32> -> vector<8x128xf32>
    %137 = arith.addf %134, %136 : vector<8x128xf32>
    %138 = vector.extract_strided_slice %137 {offsets = [0, 0], sizes = [8, 32], strides = [1, 1]} : vector<8x128xf32> to vector<8x32xf32>
    %139 = arith.negf %138 : vector<8x32xf32>
    %140 = math.exp %139 : vector<8x32xf32>
    %cst_25 = arith.constant 1.000000e+00 : f32
    %141 = vector.broadcast %cst_25 : f32 to vector<8x32xf32>
    %142 = arith.addf %141, %140 : vector<8x32xf32>
    %143 = arith.divf %141, %142 : vector<8x32xf32>
    %144 = vector.extract_strided_slice %137 {offsets = [0, 32], sizes = [8, 32], strides = [1, 1]} : vector<8x128xf32> to vector<8x32xf32>
    %145 = arith.negf %144 : vector<8x32xf32>
    %146 = math.exp %145 : vector<8x32xf32>
    %cst_26 = arith.constant 1.000000e+00 : f32
    %147 = vector.broadcast %cst_26 : f32 to vector<8x32xf32>
    %148 = arith.addf %147, %146 : vector<8x32xf32>
    %149 = arith.divf %147, %148 : vector<8x32xf32>
    %150 = vector.extract_strided_slice %137 {offsets = [0, 64], sizes = [8, 32], strides = [1, 1]} : vector<8x128xf32> to vector<8x32xf32>
    %151 = math.tanh %150 : vector<8x32xf32>
    %152 = vector.extract_strided_slice %137 {offsets = [0, 96], sizes = [8, 32], strides = [1, 1]} : vector<8x128xf32> to vector<8x32xf32>
    %153 = arith.negf %152 : vector<8x32xf32>
    %154 = math.exp %153 : vector<8x32xf32>
    %cst_27 = arith.constant 1.000000e+00 : f32
    %155 = vector.broadcast %cst_27 : f32 to vector<8x32xf32>
    %156 = arith.addf %155, %154 : vector<8x32xf32>
    %157 = arith.divf %155, %156 : vector<8x32xf32>
    %158 = arith.mulf %149, %126 : vector<8x32xf32>
    %159 = arith.mulf %143, %151 : vector<8x32xf32>
    %160 = arith.addf %158, %159 : vector<8x32xf32>
    %161 = math.tanh %160 : vector<8x32xf32>
    %162 = arith.mulf %157, %161 : vector<8x32xf32>
    %c3_i32 = arith.constant 3 : i32
    %163 = vector.broadcast %c3_i32 : i32 to vector<8x1xi32>
    %164 = arith.cmpi sgt, %7, %163 : vector<8x1xi32>
    %165 = vector.shape_cast %164 : vector<8x1xi1> to vector<8x1xi1>
    %166 = vector.broadcast %165 : vector<8x1xi1> to vector<8x32xi1>
    %167 = arith.select %166, %160, %126 : vector<8x32xi1>, vector<8x32xf32>
    %168 = vector.shape_cast %164 : vector<8x1xi1> to vector<8x1xi1>
    %169 = vector.broadcast %168 : vector<8x1xi1> to vector<8x32xi1>
    %170 = arith.select %169, %162, %129 : vector<8x32xi1>, vector<8x32xf32>
    %171 = arith.maximumf %133, %162 : vector<8x32xf32>
    %172 = vector.shape_cast %164 : vector<8x1xi1> to vector<8x1xi1>
    %173 = vector.broadcast %172 : vector<8x1xi1> to vector<8x32xi1>
    %174 = arith.select %173, %171, %133 : vector<8x32xi1>, vector<8x32xf32>
    %175 = vector.extract_strided_slice %5 {offsets = [32, 0], sizes = [8, 128], strides = [1, 1]} : vector<64x128xf32> to vector<8x128xf32>
    %176 = arith.truncf %170 : vector<8x32xf32> to vector<8x32xbf16>
    %cst_28 = arith.constant dense<0.000000e+00> : vector<8x128xf32>
    %177 = tpu.matmul %176, %6, %cst_28 {dimension_numbers = #tpu.dot_dimension_numbers<[1], [0], [0], [1], [0, 0, 1, 1], [], []>} : vector<8x32xbf16>, vector<32x128xbf16>, vector<8x128xf32> -> vector<8x128xf32>
    %178 = arith.addf %175, %177 : vector<8x128xf32>
    %179 = vector.extract_strided_slice %178 {offsets = [0, 0], sizes = [8, 32], strides = [1, 1]} : vector<8x128xf32> to vector<8x32xf32>
    %180 = arith.negf %179 : vector<8x32xf32>
    %181 = math.exp %180 : vector<8x32xf32>
    %cst_29 = arith.constant 1.000000e+00 : f32
    %182 = vector.broadcast %cst_29 : f32 to vector<8x32xf32>
    %183 = arith.addf %182, %181 : vector<8x32xf32>
    %184 = arith.divf %182, %183 : vector<8x32xf32>
    %185 = vector.extract_strided_slice %178 {offsets = [0, 32], sizes = [8, 32], strides = [1, 1]} : vector<8x128xf32> to vector<8x32xf32>
    %186 = arith.negf %185 : vector<8x32xf32>
    %187 = math.exp %186 : vector<8x32xf32>
    %cst_30 = arith.constant 1.000000e+00 : f32
    %188 = vector.broadcast %cst_30 : f32 to vector<8x32xf32>
    %189 = arith.addf %188, %187 : vector<8x32xf32>
    %190 = arith.divf %188, %189 : vector<8x32xf32>
    %191 = vector.extract_strided_slice %178 {offsets = [0, 64], sizes = [8, 32], strides = [1, 1]} : vector<8x128xf32> to vector<8x32xf32>
    %192 = math.tanh %191 : vector<8x32xf32>
    %193 = vector.extract_strided_slice %178 {offsets = [0, 96], sizes = [8, 32], strides = [1, 1]} : vector<8x128xf32> to vector<8x32xf32>
    %194 = arith.negf %193 : vector<8x32xf32>
    %195 = math.exp %194 : vector<8x32xf32>
    %cst_31 = arith.constant 1.000000e+00 : f32
    %196 = vector.broadcast %cst_31 : f32 to vector<8x32xf32>
    %197 = arith.addf %196, %195 : vector<8x32xf32>
    %198 = arith.divf %196, %197 : vector<8x32xf32>
    %199 = arith.mulf %190, %167 : vector<8x32xf32>
    %200 = arith.mulf %184, %192 : vector<8x32xf32>
    %201 = arith.addf %199, %200 : vector<8x32xf32>
    %202 = math.tanh %201 : vector<8x32xf32>
    %203 = arith.mulf %198, %202 : vector<8x32xf32>
    %c4_i32 = arith.constant 4 : i32
    %204 = vector.broadcast %c4_i32 : i32 to vector<8x1xi32>
    %205 = arith.cmpi sgt, %7, %204 : vector<8x1xi32>
    %206 = vector.shape_cast %205 : vector<8x1xi1> to vector<8x1xi1>
    %207 = vector.broadcast %206 : vector<8x1xi1> to vector<8x32xi1>
    %208 = arith.select %207, %201, %167 : vector<8x32xi1>, vector<8x32xf32>
    %209 = vector.shape_cast %205 : vector<8x1xi1> to vector<8x1xi1>
    %210 = vector.broadcast %209 : vector<8x1xi1> to vector<8x32xi1>
    %211 = arith.select %210, %203, %170 : vector<8x32xi1>, vector<8x32xf32>
    %212 = arith.maximumf %174, %203 : vector<8x32xf32>
    %213 = vector.shape_cast %205 : vector<8x1xi1> to vector<8x1xi1>
    %214 = vector.broadcast %213 : vector<8x1xi1> to vector<8x32xi1>
    %215 = arith.select %214, %212, %174 : vector<8x32xi1>, vector<8x32xf32>
    %216 = vector.extract_strided_slice %5 {offsets = [40, 0], sizes = [8, 128], strides = [1, 1]} : vector<64x128xf32> to vector<8x128xf32>
    %217 = arith.truncf %211 : vector<8x32xf32> to vector<8x32xbf16>
    %cst_32 = arith.constant dense<0.000000e+00> : vector<8x128xf32>
    %218 = tpu.matmul %217, %6, %cst_32 {dimension_numbers = #tpu.dot_dimension_numbers<[1], [0], [0], [1], [0, 0, 1, 1], [], []>} : vector<8x32xbf16>, vector<32x128xbf16>, vector<8x128xf32> -> vector<8x128xf32>
    %219 = arith.addf %216, %218 : vector<8x128xf32>
    %220 = vector.extract_strided_slice %219 {offsets = [0, 0], sizes = [8, 32], strides = [1, 1]} : vector<8x128xf32> to vector<8x32xf32>
    %221 = arith.negf %220 : vector<8x32xf32>
    %222 = math.exp %221 : vector<8x32xf32>
    %cst_33 = arith.constant 1.000000e+00 : f32
    %223 = vector.broadcast %cst_33 : f32 to vector<8x32xf32>
    %224 = arith.addf %223, %222 : vector<8x32xf32>
    %225 = arith.divf %223, %224 : vector<8x32xf32>
    %226 = vector.extract_strided_slice %219 {offsets = [0, 32], sizes = [8, 32], strides = [1, 1]} : vector<8x128xf32> to vector<8x32xf32>
    %227 = arith.negf %226 : vector<8x32xf32>
    %228 = math.exp %227 : vector<8x32xf32>
    %cst_34 = arith.constant 1.000000e+00 : f32
    %229 = vector.broadcast %cst_34 : f32 to vector<8x32xf32>
    %230 = arith.addf %229, %228 : vector<8x32xf32>
    %231 = arith.divf %229, %230 : vector<8x32xf32>
    %232 = vector.extract_strided_slice %219 {offsets = [0, 64], sizes = [8, 32], strides = [1, 1]} : vector<8x128xf32> to vector<8x32xf32>
    %233 = math.tanh %232 : vector<8x32xf32>
    %234 = vector.extract_strided_slice %219 {offsets = [0, 96], sizes = [8, 32], strides = [1, 1]} : vector<8x128xf32> to vector<8x32xf32>
    %235 = arith.negf %234 : vector<8x32xf32>
    %236 = math.exp %235 : vector<8x32xf32>
    %cst_35 = arith.constant 1.000000e+00 : f32
    %237 = vector.broadcast %cst_35 : f32 to vector<8x32xf32>
    %238 = arith.addf %237, %236 : vector<8x32xf32>
    %239 = arith.divf %237, %238 : vector<8x32xf32>
    %240 = arith.mulf %231, %208 : vector<8x32xf32>
    %241 = arith.mulf %225, %233 : vector<8x32xf32>
    %242 = arith.addf %240, %241 : vector<8x32xf32>
    %243 = math.tanh %242 : vector<8x32xf32>
    %244 = arith.mulf %239, %243 : vector<8x32xf32>
    %c5_i32 = arith.constant 5 : i32
    %245 = vector.broadcast %c5_i32 : i32 to vector<8x1xi32>
    %246 = arith.cmpi sgt, %7, %245 : vector<8x1xi32>
    %247 = vector.shape_cast %246 : vector<8x1xi1> to vector<8x1xi1>
    %248 = vector.broadcast %247 : vector<8x1xi1> to vector<8x32xi1>
    %249 = arith.select %248, %242, %208 : vector<8x32xi1>, vector<8x32xf32>
    %250 = vector.shape_cast %246 : vector<8x1xi1> to vector<8x1xi1>
    %251 = vector.broadcast %250 : vector<8x1xi1> to vector<8x32xi1>
    %252 = arith.select %251, %244, %211 : vector<8x32xi1>, vector<8x32xf32>
    %253 = arith.maximumf %215, %244 : vector<8x32xf32>
    %254 = vector.shape_cast %246 : vector<8x1xi1> to vector<8x1xi1>
    %255 = vector.broadcast %254 : vector<8x1xi1> to vector<8x32xi1>
    %256 = arith.select %255, %253, %215 : vector<8x32xi1>, vector<8x32xf32>
    %257 = vector.extract_strided_slice %5 {offsets = [48, 0], sizes = [8, 128], strides = [1, 1]} : vector<64x128xf32> to vector<8x128xf32>
    %258 = arith.truncf %252 : vector<8x32xf32> to vector<8x32xbf16>
    %cst_36 = arith.constant dense<0.000000e+00> : vector<8x128xf32>
    %259 = tpu.matmul %258, %6, %cst_36 {dimension_numbers = #tpu.dot_dimension_numbers<[1], [0], [0], [1], [0, 0, 1, 1], [], []>} : vector<8x32xbf16>, vector<32x128xbf16>, vector<8x128xf32> -> vector<8x128xf32>
    %260 = arith.addf %257, %259 : vector<8x128xf32>
    %261 = vector.extract_strided_slice %260 {offsets = [0, 0], sizes = [8, 32], strides = [1, 1]} : vector<8x128xf32> to vector<8x32xf32>
    %262 = arith.negf %261 : vector<8x32xf32>
    %263 = math.exp %262 : vector<8x32xf32>
    %cst_37 = arith.constant 1.000000e+00 : f32
    %264 = vector.broadcast %cst_37 : f32 to vector<8x32xf32>
    %265 = arith.addf %264, %263 : vector<8x32xf32>
    %266 = arith.divf %264, %265 : vector<8x32xf32>
    %267 = vector.extract_strided_slice %260 {offsets = [0, 32], sizes = [8, 32], strides = [1, 1]} : vector<8x128xf32> to vector<8x32xf32>
    %268 = arith.negf %267 : vector<8x32xf32>
    %269 = math.exp %268 : vector<8x32xf32>
    %cst_38 = arith.constant 1.000000e+00 : f32
    %270 = vector.broadcast %cst_38 : f32 to vector<8x32xf32>
    %271 = arith.addf %270, %269 : vector<8x32xf32>
    %272 = arith.divf %270, %271 : vector<8x32xf32>
    %273 = vector.extract_strided_slice %260 {offsets = [0, 64], sizes = [8, 32], strides = [1, 1]} : vector<8x128xf32> to vector<8x32xf32>
    %274 = math.tanh %273 : vector<8x32xf32>
    %275 = vector.extract_strided_slice %260 {offsets = [0, 96], sizes = [8, 32], strides = [1, 1]} : vector<8x128xf32> to vector<8x32xf32>
    %276 = arith.negf %275 : vector<8x32xf32>
    %277 = math.exp %276 : vector<8x32xf32>
    %cst_39 = arith.constant 1.000000e+00 : f32
    %278 = vector.broadcast %cst_39 : f32 to vector<8x32xf32>
    %279 = arith.addf %278, %277 : vector<8x32xf32>
    %280 = arith.divf %278, %279 : vector<8x32xf32>
    %281 = arith.mulf %272, %249 : vector<8x32xf32>
    %282 = arith.mulf %266, %274 : vector<8x32xf32>
    %283 = arith.addf %281, %282 : vector<8x32xf32>
    %284 = math.tanh %283 : vector<8x32xf32>
    %285 = arith.mulf %280, %284 : vector<8x32xf32>
    %c6_i32 = arith.constant 6 : i32
    %286 = vector.broadcast %c6_i32 : i32 to vector<8x1xi32>
    %287 = arith.cmpi sgt, %7, %286 : vector<8x1xi32>
    %288 = vector.shape_cast %287 : vector<8x1xi1> to vector<8x1xi1>
    %289 = vector.broadcast %288 : vector<8x1xi1> to vector<8x32xi1>
    %290 = arith.select %289, %283, %249 : vector<8x32xi1>, vector<8x32xf32>
    %291 = vector.shape_cast %287 : vector<8x1xi1> to vector<8x1xi1>
    %292 = vector.broadcast %291 : vector<8x1xi1> to vector<8x32xi1>
    %293 = arith.select %292, %285, %252 : vector<8x32xi1>, vector<8x32xf32>
    %294 = arith.maximumf %256, %285 : vector<8x32xf32>
    %295 = vector.shape_cast %287 : vector<8x1xi1> to vector<8x1xi1>
    %296 = vector.broadcast %295 : vector<8x1xi1> to vector<8x32xi1>
    %297 = arith.select %296, %294, %256 : vector<8x32xi1>, vector<8x32xf32>
    %298 = vector.extract_strided_slice %5 {offsets = [56, 0], sizes = [8, 128], strides = [1, 1]} : vector<64x128xf32> to vector<8x128xf32>
    %299 = arith.truncf %293 : vector<8x32xf32> to vector<8x32xbf16>
    %cst_40 = arith.constant dense<0.000000e+00> : vector<8x128xf32>
    %300 = tpu.matmul %299, %6, %cst_40 {dimension_numbers = #tpu.dot_dimension_numbers<[1], [0], [0], [1], [0, 0, 1, 1], [], []>} : vector<8x32xbf16>, vector<32x128xbf16>, vector<8x128xf32> -> vector<8x128xf32>
    %301 = arith.addf %298, %300 : vector<8x128xf32>
    %302 = vector.extract_strided_slice %301 {offsets = [0, 0], sizes = [8, 32], strides = [1, 1]} : vector<8x128xf32> to vector<8x32xf32>
    %303 = arith.negf %302 : vector<8x32xf32>
    %304 = math.exp %303 : vector<8x32xf32>
    %cst_41 = arith.constant 1.000000e+00 : f32
    %305 = vector.broadcast %cst_41 : f32 to vector<8x32xf32>
    %306 = arith.addf %305, %304 : vector<8x32xf32>
    %307 = arith.divf %305, %306 : vector<8x32xf32>
    %308 = vector.extract_strided_slice %301 {offsets = [0, 32], sizes = [8, 32], strides = [1, 1]} : vector<8x128xf32> to vector<8x32xf32>
    %309 = arith.negf %308 : vector<8x32xf32>
    %310 = math.exp %309 : vector<8x32xf32>
    %cst_42 = arith.constant 1.000000e+00 : f32
    %311 = vector.broadcast %cst_42 : f32 to vector<8x32xf32>
    %312 = arith.addf %311, %310 : vector<8x32xf32>
    %313 = arith.divf %311, %312 : vector<8x32xf32>
    %314 = vector.extract_strided_slice %301 {offsets = [0, 64], sizes = [8, 32], strides = [1, 1]} : vector<8x128xf32> to vector<8x32xf32>
    %315 = math.tanh %314 : vector<8x32xf32>
    %316 = vector.extract_strided_slice %301 {offsets = [0, 96], sizes = [8, 32], strides = [1, 1]} : vector<8x128xf32> to vector<8x32xf32>
    %317 = arith.negf %316 : vector<8x32xf32>
    %318 = math.exp %317 : vector<8x32xf32>
    %cst_43 = arith.constant 1.000000e+00 : f32
    %319 = vector.broadcast %cst_43 : f32 to vector<8x32xf32>
    %320 = arith.addf %319, %318 : vector<8x32xf32>
    %321 = arith.divf %319, %320 : vector<8x32xf32>
    %322 = arith.mulf %313, %290 : vector<8x32xf32>
    %323 = arith.mulf %307, %315 : vector<8x32xf32>
    %324 = arith.addf %322, %323 : vector<8x32xf32>
    %325 = math.tanh %324 : vector<8x32xf32>
    %326 = arith.mulf %321, %325 : vector<8x32xf32>
    %c7_i32 = arith.constant 7 : i32
    %327 = vector.broadcast %c7_i32 : i32 to vector<8x1xi32>
    %328 = arith.cmpi sgt, %7, %327 : vector<8x1xi32>
    %329 = arith.maximumf %297, %326 : vector<8x32xf32>
    %330 = vector.shape_cast %328 : vector<8x1xi1> to vector<8x1xi1>
    %331 = vector.broadcast %330 : vector<8x1xi1> to vector<8x32xi1>
    %332 = arith.select %331, %329, %297 : vector<8x32xi1>, vector<8x32xf32>
    %c0_44 = arith.constant 0 : index
    %c0_45 = arith.constant 0 : index
    %333 = vector.load %arg6[%c0_44, %c0_45] : memref<32x32xbf16, #tpu.memory_space<vmem>>, vector<32x32xbf16>
    %c0_46 = arith.constant 0 : index
    %c0_47 = arith.constant 0 : index
    %334 = vector.load %arg8[%c0_46, %c0_47] : memref<32x2xbf16, #tpu.memory_space<vmem>>, vector<32x2xbf16>
    %335 = arith.truncf %332 : vector<8x32xf32> to vector<8x32xbf16>
    %cst_48 = arith.constant dense<0.000000e+00> : vector<8x32xf32>
    %336 = tpu.matmul %335, %333, %cst_48 {dimension_numbers = #tpu.dot_dimension_numbers<[1], [0], [0], [1], [0, 0, 1, 1], [], []>} : vector<8x32xbf16>, vector<32x32xbf16>, vector<8x32xf32> -> vector<8x32xf32>
    %c0_49 = arith.constant 0 : index
    %c0_50 = arith.constant 0 : index
    %337 = vector.load %arg7[%c0_49, %c0_50] : memref<1x32xf32, #tpu.memory_space<vmem>>, vector<1x32xf32>
    %338 = vector.broadcast %337 : vector<1x32xf32> to vector<8x32xf32>
    %339 = arith.addf %336, %338 : vector<8x32xf32>
    %340 = math.tanh %339 : vector<8x32xf32>
    %341 = arith.truncf %340 : vector<8x32xf32> to vector<8x32xbf16>
    %cst_51 = arith.constant dense<0.000000e+00> : vector<8x2xf32>
    %342 = tpu.matmul %341, %334, %cst_51 {dimension_numbers = #tpu.dot_dimension_numbers<[1], [0], [0], [1], [0, 0, 1, 1], [], []>} : vector<8x32xbf16>, vector<32x2xbf16>, vector<8x2xf32> -> vector<8x2xf32>
    %c0_52 = arith.constant 0 : index
    %c0_53 = arith.constant 0 : index
    %343 = vector.load %arg9[%c0_52, %c0_53] : memref<1x2xf32, #tpu.memory_space<vmem>>, vector<1x2xf32>
    %344 = vector.broadcast %343 : vector<1x2xf32> to vector<8x2xf32>
    %345 = arith.addf %342, %344 : vector<8x2xf32>
    %c0_54 = arith.constant 0 : index
    %c0_55 = arith.constant 0 : index
    %346 = vector.load %arg11[%c0_54, %c0_55] : memref<8x2xf32, #tpu.memory_space<vmem>>, vector<8x2xf32>
    tpu.vector_store %arg11[%c0_54, %c0_55], %345 {strides = array<i32>} : memref<8x2xf32, #tpu.memory_space<vmem>>, vector<8x2xf32>,
    %cst_56 = arith.constant dense<0xFF800000> : vector<8xf32>
    %347 = vector.multi_reduction <maximumf>, %345, %cst_56 [1] : vector<8x2xf32> to vector<8xf32>
    %348 = vector.shape_cast %347 : vector<8xf32> to vector<8x1xf32>
    %349 = vector.broadcast %348 : vector<8x1xf32> to vector<8x2xf32>
    %350 = arith.subf %345, %349 : vector<8x2xf32>
    %351 = math.exp %350 : vector<8x2xf32>
    %cst_57 = arith.constant dense<0.000000e+00> : vector<8xf32>
    %352 = vector.multi_reduction <add>, %351, %cst_57 [1] : vector<8x2xf32> to vector<8xf32>
    %353 = vector.shape_cast %352 : vector<8xf32> to vector<8x1xf32>
    %354 = vector.broadcast %353 : vector<8x1xf32> to vector<8x2xf32>
    %355 = arith.divf %351, %354 : vector<8x2xf32>
    %c0_58 = arith.constant 0 : index
    %c0_59 = arith.constant 0 : index
    %356 = vector.load %arg12[%c0_58, %c0_59] : memref<8x2xf32, #tpu.memory_space<vmem>>, vector<8x2xf32>
    tpu.vector_store %arg12[%c0_58, %c0_59], %355 {strides = array<i32>} : memref<8x2xf32, #tpu.memory_space<vmem>>, vector<8x2xf32>,
    %357 = vector.extract_strided_slice %355 {offsets = [0, 1], sizes = [8, 1], strides = [1, 1]} : vector<8x2xf32> to vector<8x1xf32>
    %c0_60 = arith.constant 0 : index
    %c0_61 = arith.constant 0 : index
    %358 = vector.load %arg2[%c0_60, %c0_61] : memref<8x1xf32, #tpu.memory_space<vmem>>, vector<8x1xf32>
    %c0_62 = arith.constant 0 : index
    %c0_63 = arith.constant 0 : index
    %359 = memref.load %arg10[%c0_62, %c0_63] : memref<1x3xf32, #tpu.memory_space<smem>>
    %c0_64 = arith.constant 0 : index
    %c1 = arith.constant 1 : index
    %360 = memref.load %arg10[%c0_64, %c1] : memref<1x3xf32, #tpu.memory_space<smem>>
    %c0_65 = arith.constant 0 : index
    %c2 = arith.constant 2 : index
    %361 = memref.load %arg10[%c0_65, %c2] : memref<1x3xf32, #tpu.memory_space<smem>>
    %362 = vector.shape_cast %358 : vector<8x1xf32> to vector<1x8x1xf32>
    %cst_66 = arith.constant dense<0.000000e+00> : vector<1xf32>
    %363 = vector.multi_reduction <add>, %362, %cst_66 [1, 2] : vector<1x8x1xf32> to vector<1xf32>
    %364 = vector.shape_cast %363 : vector<1xf32> to vector<1x1x1xf32>
    %365 = vector.extract %364[0, 0, 0] : f32 from vector<1x1x1xf32>
    %cst_67 = arith.constant 8.000000e+00 : f32
    %366 = arith.divf %365, %cst_67 : f32
    %cst_68 = arith.constant 1.000000e+00 : f32
    %367 = vector.broadcast %cst_68 : f32 to vector<8x1xf32>
    %368 = arith.subf %367, %358 : vector<8x1xf32>
    %cst_69 = arith.constant 1.000000e+00 : f32
    %369 = arith.subf %cst_69, %366 : f32
    %370 = vector.broadcast %359 : f32 to vector<8x1xf32>
    %371 = arith.subf %357, %370 : vector<8x1xf32>
    %372 = arith.mulf %371, %371 : vector<8x1xf32>
    %373 = arith.mulf %372, %358 : vector<8x1xf32>
    %374 = vector.shape_cast %373 : vector<8x1xf32> to vector<1x8x1xf32>
    %cst_70 = arith.constant dense<0.000000e+00> : vector<1xf32>
    %375 = vector.multi_reduction <add>, %374, %cst_70 [1, 2] : vector<1x8x1xf32> to vector<1xf32>
    %376 = vector.shape_cast %375 : vector<1xf32> to vector<1x1x1xf32>
    %377 = vector.extract %376[0, 0, 0] : f32 from vector<1x1x1xf32>
    %cst_71 = arith.constant 8.000000e+00 : f32
    %378 = arith.divf %377, %cst_71 : f32
    %379 = arith.mulf %369, %378 : f32
    %380 = vector.broadcast %360 : f32 to vector<8x1xf32>
    %381 = arith.subf %357, %380 : vector<8x1xf32>
    %382 = arith.mulf %381, %381 : vector<8x1xf32>
    %383 = arith.mulf %382, %368 : vector<8x1xf32>
    %384 = vector.shape_cast %383 : vector<8x1xf32> to vector<1x8x1xf32>
    %cst_72 = arith.constant dense<0.000000e+00> : vector<1xf32>
    %385 = vector.multi_reduction <add>, %384, %cst_72 [1, 2] : vector<1x8x1xf32> to vector<1xf32>
    %386 = vector.shape_cast %385 : vector<1xf32> to vector<1x1x1xf32>
    %387 = vector.extract %386[0, 0, 0] : f32 from vector<1x1x1xf32>
    %cst_73 = arith.constant 8.000000e+00 : f32
    %388 = arith.divf %387, %cst_73 : f32
    %389 = arith.mulf %366, %388 : f32
    %390 = arith.addf %379, %389 : f32
    %cst_74 = arith.constant 2.000000e+00 : f32
    %391 = arith.mulf %cst_74, %361 : f32
    %cst_75 = arith.constant 1.000000e+00 : f32
    %392 = arith.subf %cst_75, %366 : f32
    %393 = arith.mulf %366, %392 : f32
    %394 = vector.broadcast %366 : f32 to vector<8x1xf32>
    %395 = arith.mulf %394, %357 : vector<8x1xf32>
    %396 = arith.mulf %395, %368 : vector<8x1xf32>
    %cst_76 = arith.constant 1.000000e+00 : f32
    %397 = arith.subf %cst_76, %366 : f32
    %398 = vector.broadcast %397 : f32 to vector<8x1xf32>
    %399 = arith.mulf %398, %357 : vector<8x1xf32>
    %400 = arith.mulf %399, %358 : vector<8x1xf32>
    %401 = arith.subf %396, %400 : vector<8x1xf32>
    %402 = vector.shape_cast %401 : vector<8x1xf32> to vector<1x8x1xf32>
    %cst_77 = arith.constant dense<0.000000e+00> : vector<1xf32>
    %403 = vector.multi_reduction <add>, %402, %cst_77 [1, 2] : vector<1x8x1xf32> to vector<1xf32>
    %404 = vector.shape_cast %403 : vector<1xf32> to vector<1x1x1xf32>
    %405 = vector.extract %404[0, 0, 0] : f32 from vector<1x1x1xf32>
    %cst_78 = arith.constant 8.000000e+00 : f32
    %406 = arith.divf %405, %cst_78 : f32
    %407 = arith.addf %393, %406 : f32
    %408 = arith.mulf %391, %407 : f32
    %409 = arith.addf %390, %408 : f32
    %cst_79 = arith.constant 1.000000e+00 : f32
    %410 = arith.subf %cst_79, %366 : f32
    %411 = arith.mulf %366, %410 : f32
    %412 = arith.mulf %361, %361 : f32
    %413 = arith.mulf %411, %412 : f32
    %414 = arith.subf %409, %413 : f32
    %c0_80 = arith.constant 0 : index
    %c0_81 = arith.constant 0 : index
    %415 = memref.load %arg13[%c0_80, %c0_81] : memref<1x1xf32, #tpu.memory_space<smem>>
    memref.store %414, %arg13[%c0_80, %c0_81] : memref<1x1xf32, #tpu.memory_space<smem>>
    return
  }
}

</mosaic_0001>

<bundles_post_ra>
// kernel: learner_eval_step.1
= control target key start
LH: loop header
LB: loop body
LE: loop exit
PB: predicated region body
PF: predicated region fallthrough
CT: control target
= control target key end

     0   :  { %19 = vsyncpa [#allocation4], 0  ;;  %s1452_s0 = inlined_call_operand.vmem [shape: bf16[64,32], index: 0, kind: input, shape index: {}]   ;;  %s1453_s1 = inlined_call_operand.vmem [shape: s32[8,1], index: 1, kind: input, shape index: {}]   ;;  %s1454_s2 = inlined_call_operand.vmem [shape: f32[8,1], index: 2, kind: input, shape index: {}]   ;;  %s1455_s3 = inlined_call_operand.vmem [shape: bf16[32,128], index: 3, kind: input, shape index: {}]   ;;  %s1456_s4 = inlined_call_operand.vmem [shape: bf16[32,128], index: 4, kind: input, shape index: {}]   ;;  %s1457_s5 = inlined_call_operand.vmem [shape: f32[1,128], index: 5, kind: input, shape index: {}]   ;;  %s1458_s6 = inlined_call_operand.vmem [shape: bf16[32,32], index: 6, kind: input, shape index: {}]   ;;  %s1459_s7 = inlined_call_operand.vmem [shape: f32[1,32], index: 7, kind: input, shape index: {}]   ;;  %s1460_s8 = inlined_call_operand.vmem [shape: bf16[32,2], index: 8, kind: input, shape index: {}]   ;;  %s1461_s9 = inlined_call_operand.vmem [shape: f32[1,2], index: 9, kind: input, shape index: {}]   ;;  %s1462_s10 = inlined_call_operand.vmem [shape: f32[1,3], index: 10, kind: input, shape index: {}]   ;;  %s1463_s11 = inlined_call_operand.vmem [shape: f32[8,2], index: 11, kind: output, shape index: {0}]   ;;  %s1464_s12 = inlined_call_operand.vmem [shape: f32[8,2], index: 12, kind: output, shape index: {1}]   ;;  %s1465_s13 = inlined_call_operand.hbm [shape: f32[1,1], index: 13, kind: output, shape index: {2}]  }
   0x1   :  { %20 = vsyncpa [#allocation3], 0  ;;  %s46_s27 = sshll.u32 %s1462_s10, 4  ;;  %s1168_s28 = smov [#allocation2]   ;;  %s47_s27 = int_to_ptr.vmem [resolvable:$true] %s46_s27 }
   0x2   :  { %49 = dma.vmem_to_smem %s47_s27, 16, %s1168_s28, [#allocation4]  }
   0x3   :  { %1164 = dma.done.wait [#allocation4], 16  }
   0x4   :  { %1165 = vsyncadd [#allocation4], 4294967280 }
   0x5   :  { %54 = sfence }
   0x6   :  { %v1037_v0 = vld [vmem:[%s1455_s3 + $0x8] sm:$0xff]  ;;  %v1036_v2 = vld [vmem:[%s1455_s3] sm:$0xff]  ;;  %v1169_v3 = vmov 0   ;;  %vm104_vm0 = vcmask 261120   ;;  %s1170_s21 = smov 64   ;;  %s1174_s25 = smov 127  }
   0x7   :  { %v1255_v1 = vld [vmem:[%s1456_s4 + $0x8] sm:$0xff]  ;;  %1062 = vset.pattern.permute.xlu1 %v1169_v3  ;;  %1063 = vset.pattern.permute.xlu2 %v1169_v3  ;;  %v1266_v4 = vld [vmem:[%s1456_s4] sm:$0xff]  ;;  %s946_s4 = sshll.u32 %s1465_s13, 4  ;;  %s947_s4 = int_to_ptr.hbm [resolvable:$true] %s946_s4 }
   0x8   :  { %123 = vmatpush.bf16.msra.mxu0 %v1037_v0  ;;  %172 = vmatpush.bf16.msra.mxu1 %v1255_v1  ;;  %v1032_v5 = vld [vmem:[%s1452_s0] sm:$0xff] }
   0x9   :  { %240 = vmatpush.bf16.msra.mxu2 %v1255_v1  ;;  %308 = vmatpush.bf16.msra.mxu3 %v1255_v1  ;;  %v1290_v6 = vld [vmem:[%s1457_s5] ss:$0 sm:$0xff]  ;;  %s1171_s5 = smov 32  }
   0xa   :  { %1064 = vset.pattern.permute.xlu0 %v1169_v3  ;;  %v1298_v32 = vld [vmem:[%s1453_s1] sm:$0xff] }
   0xb   :  { %vm217_vm5 = vcmp.gt.s32.totalorder %v1298_v32, 0  ;;  %vm285_vm7 = vcmp.gt.s32.totalorder %v1298_v32, 1  ;;  %vm353_vm13 = vcmp.gt.s32.totalorder %v1298_v32, 2 }
   0xc   :  { %124 = vmatpush.bf16.msra.mxu0 %v1036_v2  ;;  %173 = vmatpush.bf16.msra.mxu1 %v1266_v4  ;;  %v218_v33 = vsel %vm217_vm5, 1, %v1169_v3  ;;  %v286_v51 = vsel %vm285_vm7, 1, %v1169_v3  ;;  %vm489_vm5 = vcmp.gt.s32.totalorder %v1298_v32, 4 }
   0xd   :  { %241 = vmatpush.bf16.msra.mxu2 %v1266_v4  ;;  %309 = vmatpush.bf16.msra.mxu3 %v1266_v4 }
   0xf   :  { %985 = vmatmul.msk.bf16.vlgmr.msra.gmra.mxu0 %vm104_vm0, %v1032_v5  ;;  %174 = vmatmul.bf16.vlgmr.msra.gmra.mxu1 %v1169_v3 }
  0x10   :  { %376 = vmatpush.bf16.msrb.mxu1 %v1255_v1 }
  0x11   :  { %444 = vmatpush.bf16.msrb.mxu2 %v1255_v1  ;;  %512 = vmatpush.bf16.msrb.mxu3 %v1255_v1 }
  0x14   :  { %377 = vmatpush.bf16.msrb.mxu1 %v1266_v4 }
  0x15   :  { %445 = vmatpush.bf16.msrb.mxu2 %v1266_v4  ;;  %513 = vmatpush.bf16.msrb.mxu3 %v1266_v4 }
  0x18   :  { %580 = vmatpush.bf16.msra.mxu1 %v1255_v1 }
  0x1c   :  { %581 = vmatpush.bf16.msra.mxu1 %v1266_v4 }
  0x8c   :  { %v126_v7 = vpop.f32.mrf.mxu0  ;;  %v175_v8 = vpop.f32.mrf.mxu1 }
  0x8d   :  { %v127_v9 = vadd.f32 %v1290_v6, %v126_v7  ;;  %v1033_v7 = vld [vmem:[%s1452_s0 + $0x8] sm:$0xff] }
  0x8e   :  { %986 = vmatmul.msk.bf16.gmra.mxu0 %vm104_vm0, %v1033_v7 }
  0x8f   :  { %v179_v10 = vadd.f32 %v175_v8, %v127_v9 }
  0x91   :  { %1068 = vtanh.f32 %v179_v10  ;;  %v997_v13 = vmul.f32 -1.442695, %v179_v10 }
  0x93   :  { %1070 = vpow2.f32 %v997_v13 }
  0x94   :  { %v177_v11 = vpop.f32.mrf.mxu1  ;;  %v128_v42 = vpop.f32.mrf.mxu0 }
  0x95   :  { %v129_v43 = vadd.f32 %v1290_v6, %v128_v42 }
  0x97   :  { %v1069_v12 = vpop.eup %1068 }
  0x98   :  { %202 = vrot.lane.b32.xlu0 %v1069_v12, %s1170_s21 }
  0x99   :  { %v1071_v14 = vpop.eup %1070 }
  0x9a   :  { %v183_v15 = vadd.f32 1.0, %v1071_v14 }
  0x9c   :  { %1072 = vrcp.f32 %v183_v15  ;;  %v195_v21 = vand.u32 2147483648, %v183_v15  ;;  %vm189_vm2 = vweird.f32 %v183_v15  ;;  %v193_v22 = vand.u32 2147483647, %v183_v15 }
  0x9e   :  { %v196_v24 = vor.u32 1.1754944e-38, %v195_v21  ;;  %vm194_vm4 = vcmp.eq.f32.partialorder %v193_v22, 8.507059e+37  ;;  %v354_v22 = vsel %vm353_vm13, 1, %v1169_v3 }
  0xa2   :  { %v1073_v16 = vpop.eup %1072 }
  0xa3   :  { %v185_v17 = vmul.f32 %v1073_v16, %v183_v15  ;;  %vm190_vm1 = vweird.f32 %v1073_v16 }
  0xa4   :  { %vm191_vm3 = vmor %vm189_vm2, %vm190_vm1 }
  0xa5   :  { %v186_v18 = vsub.f32 1.0, %v185_v17 }
  0xa7   :  { %v187_v19 = vmul.f32 %v1073_v16, %v186_v18 }
  0xa9   :  { %v188_v20 = vadd.f32 %v1073_v16, %v187_v19 }
  0xab   :  { %v192_v23 = vsel %vm191_vm3, %v1073_v16, %v188_v20 }
  0xac   :  { %v197_v26 = vsel %vm194_vm4, %v196_v24, %v192_v23  ;;  %vm421_vm4 = vcmp.gt.s32.totalorder %v1298_v32, 3 }
  0xad   :  { %v200_v28 = vmul.f32 0.0, %v197_v26 }
 0x10a   :  { %v203_v25 = vpop.permute.xlu0 %202 }
 0x10b   :  { %v205_v27 = vmul.f32 %v203_v25, %v197_v26  ;;  %v131_v16 = vpop.f32.mrf.mxu0 }
 0x10c   :  { %v132_v17 = vadd.f32 %v1290_v6, %v131_v16 }
 0x10d   :  { %207 = vrot.lane.b32.xlu0 %v205_v27, %s1171_s5 }
 0x17f   :  { %v208_v29 = vpop.permute.xlu0 %207 }
 0x180   :  { %v210_v30 = vadd.f32 %v208_v29, %v200_v28 }
 0x182   :  { %1074 = vtanh.f32 %v210_v30 }
 0x188   :  { %v1075_v31 = vpop.eup %1074 }
 0x189   :  { %213 = vrot.lane.b32.xlu1 %v1075_v31, %s1170_s21 }
 0x191   :  { %220 = vperm.xlu1 %1062, %v218_v33  }
 0x1fb   :  { %v214_v34 = vpop.permute.xlu1 %213 }
 0x1fc   :  { %v216_v35 = vmul.f32 %v214_v34, %v197_v26 }
 0x1fe   :  { %v225_v36 = vmax.f32 %v216_v35, -3e+38 }
 0x203   :  { %v221_v37 = vpop.permute.xlu1 %220 }
 0x204   :  { %vm222_vm6 = vcmp.eq.s32.totalorder %v221_v37, 1 }
 0x205   :  { %v226_v38 = vsel %vm222_vm6, %v225_v36, -3e+38  ;;  %v224_v39 = vsel %vm222_vm6, %v216_v35, 0.0  ;;  %v223_v0 = vsel %vm222_vm6, %v210_v30, 0.0 }
 0x206   :  { %v227_v40 = vpack.c.bf16 %v224_v39, %v224_v39 }
 0x208   :  { %229 = vrot.lane.b32.xlu2 %v227_v40, %s1171_s5 }
 0x262   :  { %v230_v41 = vpop.permute.xlu2 %229 }
 0x263   :  { %998 = vmatmul.msk.bf16.vlgmr.msra.gmra.mxu2 %vm104_vm0, %v230_v41 }
 0x264   :  { %648 = vmatpush.bf16.msra.mxu2 %v1255_v1 }
 0x268   :  { %649 = vmatpush.bf16.msra.mxu2 %v1266_v4 }
 0x2e6   :  { %v243_v44 = vpop.f32.mrf.mxu2 }
 0x2e7   :  { %v247_v45 = vadd.f32 %v243_v44, %v129_v43 }
 0x2e9   :  { %1076 = vtanh.f32 %v247_v45  ;;  %v999_v48 = vmul.f32 -1.442695, %v247_v45 }
 0x2eb   :  { %1078 = vpow2.f32 %v999_v48 }
 0x2ee   :  { %v245_v46 = vpop.f32.mrf.mxu2 }
 0x2ef   :  { %v1077_v47 = vpop.eup %1076 }
 0x2f0   :  { %270 = vrot.lane.b32.xlu2 %v1077_v47, %s1170_s21 }
 0x2f1   :  { %v1079_v49 = vpop.eup %1078 }
 0x2f2   :  { %v251_v50 = vadd.f32 1.0, %v1079_v49 }
 0x2f4   :  { %1080 = vrcp.f32 %v251_v50  ;;  %v263_v57 = vand.u32 2147483648, %v251_v50  ;;  %vm257_vm9 = vweird.f32 %v251_v50  ;;  %v261_v58 = vand.u32 2147483647, %v251_v50 }
 0x2f6   :  { %v264_v60 = vor.u32 1.1754944e-38, %v263_v57  ;;  %vm262_vm11 = vcmp.eq.f32.partialorder %v261_v58, 8.507059e+37 }
 0x2f8   :  { %288 = vperm.xlu2 %1063, %v286_v51  }
 0x2fa   :  { %v1081_v52 = vpop.eup %1080 }
 0x2fb   :  { %v253_v53 = vmul.f32 %v1081_v52, %v251_v50  ;;  %vm258_vm8 = vweird.f32 %v1081_v52 }
 0x2fc   :  { %vm259_vm10 = vmor %vm257_vm9, %vm258_vm8 }
 0x2fd   :  { %v254_v54 = vsub.f32 1.0, %v253_v53 }
 0x2ff   :  { %v255_v55 = vmul.f32 %v1081_v52, %v254_v54 }
 0x301   :  { %v256_v56 = vadd.f32 %v1081_v52, %v255_v55 }
 0x303   :  { %v260_v59 = vsel %vm259_vm10, %v1081_v52, %v256_v56  ;;  %v133_v52 = vpop.f32.mrf.mxu0 }
 0x304   :  { %v265_v62 = vsel %vm262_vm11, %v264_v60, %v260_v59  ;;  %v134_v53 = vadd.f32 %v1290_v6, %v133_v52 }
 0x305   :  { %v268_v1 = vmul.f32 %v265_v62, %v223_v0 }
 0x34a   :  { %v271_v61 = vpop.permute.xlu2 %270 }
 0x34b   :  { %v273_v63 = vmul.f32 %v271_v61, %v265_v62  ;;  %v422_v61 = vsel %vm421_vm4, 1, %v1169_v3 }
 0x34d   :  { %275 = vrot.lane.b32.xlu0 %v273_v63, %s1171_s5 }
 0x352   :  { %v289_v8 = vpop.permute.xlu2 %288 }
 0x353   :  { %vm290_vm12 = vcmp.eq.s32.totalorder %v289_v8, 1 }
 0x3bf   :  { %v276_v2 = vpop.permute.xlu0 %275 }
 0x3c0   :  { %v278_v4 = vadd.f32 %v276_v2, %v268_v1 }
 0x3c2   :  { %1082 = vtanh.f32 %v278_v4 }
 0x3c8   :  { %v1083_v5 = vpop.eup %1082 }
 0x3c9   :  { %281 = vrot.lane.b32.xlu1 %v1083_v5, %s1170_s21 }
 0x43b   :  { %v282_v9 = vpop.permute.xlu1 %281 }
 0x43c   :  { %v284_v10 = vmul.f32 %v282_v9, %v265_v62  ;;  %v490_v62 = vsel %vm489_vm5, 1, %v1169_v3 }
 0x43e   :  { %v293_v11 = vmax.f32 %v226_v38, %v284_v10  ;;  %v292_v12 = vsel %vm290_vm12, %v284_v10, %v224_v39  ;;  %v291_v39 = vsel %vm290_vm12, %v278_v4, %v223_v0 }
 0x43f   :  { %v295_v13 = vpack.c.bf16 %v292_v12, %v292_v12 }
 0x440   :  { %v294_v14 = vsel %vm290_vm12, %v293_v11, %v226_v38 }
 0x441   :  { %297 = vrot.lane.b32.xlu0 %v295_v13, %s1171_s5 }
 0x4b3   :  { %v298_v15 = vpop.permute.xlu0 %297 }
 0x4b4   :  { %1000 = vmatmul.msk.bf16.vlgmr.msra.gmra.mxu3 %vm104_vm0, %v298_v15 }
 0x537   :  { %v311_v18 = vpop.f32.mrf.mxu3 }
 0x538   :  { %v315_v19 = vadd.f32 %v311_v18, %v132_v17  ;;  %v1034_v18 = vld [vmem:[%s1452_s0 + $0x10] sm:$0xff] }
 0x539   :  { %987 = vmatmul.msk.bf16.gmra.mxu0 %vm104_vm0, %v1034_v18 }
 0x53a   :  { %1084 = vtanh.f32 %v315_v19  ;;  %v1001_v23 = vmul.f32 -1.442695, %v315_v19 }
 0x53c   :  { %1086 = vpow2.f32 %v1001_v23 }
 0x53f   :  { %v313_v20 = vpop.f32.mrf.mxu3 }
 0x540   :  { %v1085_v21 = vpop.eup %1084 }
 0x541   :  { %338 = vrot.lane.b32.xlu1 %v1085_v21, %s1170_s21 }
 0x542   :  { %v1087_v24 = vpop.eup %1086 }
 0x543   :  { %v319_v25 = vadd.f32 1.0, %v1087_v24 }
 0x545   :  { %1088 = vrcp.f32 %v319_v25  ;;  %v331_v31 = vand.u32 2147483648, %v319_v25  ;;  %vm325_vm15 = vweird.f32 %v319_v25  ;;  %v329_v33 = vand.u32 2147483647, %v319_v25 }
 0x547   :  { %v332_v35 = vor.u32 1.1754944e-38, %v331_v31  ;;  %vm330_vm2 = vcmp.eq.f32.partialorder %v329_v33, 8.507059e+37 }
 0x549   :  { %356 = vperm.xlu1 %1062, %v354_v22  }
 0x54b   :  { %v1089_v26 = vpop.eup %1088 }
 0x54c   :  { %v321_v27 = vmul.f32 %v1089_v26, %v319_v25  ;;  %vm326_vm14 = vweird.f32 %v1089_v26 }
 0x54d   :  { %vm327_vm1 = vmor %vm325_vm15, %vm326_vm14 }
 0x54e   :  { %v322_v28 = vsub.f32 1.0, %v321_v27 }
 0x550   :  { %v323_v29 = vmul.f32 %v1089_v26, %v322_v28 }
 0x552   :  { %v324_v30 = vadd.f32 %v1089_v26, %v323_v29 }
 0x554   :  { %v328_v34 = vsel %vm327_vm1, %v1089_v26, %v324_v30  ;;  %vm557_vm1 = vcmp.gt.s32.totalorder %v1298_v32, 5 }
 0x555   :  { %v333_v37 = vsel %vm330_vm2, %v332_v35, %v328_v34 }
 0x556   :  { %v336_v40 = vmul.f32 %v333_v37, %v291_v39 }
 0x5b3   :  { %v339_v36 = vpop.permute.xlu1 %338 }
 0x5b4   :  { %v341_v38 = vmul.f32 %v339_v36, %v333_v37 }
 0x5b6   :  { %343 = vrot.lane.b32.xlu2 %v341_v38, %s1171_s5  ;;  %v136_v27 = vpop.f32.mrf.mxu0 }
 0x5b7   :  { %v137_v28 = vadd.f32 %v1290_v6, %v136_v27  ;;  %v1035_v27 = vld [vmem:[%s1452_s0 + $0x18] sm:$0xff] }
 0x5b8   :  { %988 = vmatmul.msk.bf16.gmra.mxu0 %vm104_vm0, %v1035_v27 }
 0x5bb   :  { %v357_v44 = vpop.permute.xlu1 %356 }
 0x5bc   :  { %vm358_vm3 = vcmp.eq.s32.totalorder %v357_v44, 1 }
 0x610   :  { %v344_v41 = vpop.permute.xlu2 %343 }
 0x611   :  { %v346_v42 = vadd.f32 %v344_v41, %v336_v40 }
 0x613   :  { %1090 = vtanh.f32 %v346_v42  ;;  %v359_v13 = vsel %vm358_vm3, %v346_v42, %v291_v39 }
 0x619   :  { %v1091_v43 = vpop.eup %1090 }
 0x61a   :  { %349 = vrot.lane.b32.xlu0 %v1091_v43, %s1170_s21 }
 0x68c   :  { %v350_v45 = vpop.permute.xlu0 %349 }
 0x68d   :  { %v352_v46 = vmul.f32 %v350_v45, %v333_v37 }
 0x68f   :  { %v361_v47 = vmax.f32 %v294_v14, %v352_v46  ;;  %v360_v48 = vsel %vm358_vm3, %v352_v46, %v292_v12 }
 0x690   :  { %v363_v49 = vpack.c.bf16 %v360_v48, %v360_v48 }
 0x691   :  { %v362_v50 = vsel %vm358_vm3, %v361_v47, %v294_v14 }
 0x692   :  { %365 = vrot.lane.b32.xlu2 %v363_v49, %s1171_s5 }
 0x6ec   :  { %v366_v51 = vpop.permute.xlu2 %365 }
 0x6ed   :  { %1002 = vmatmul.msk.bf16.vlgmr.msrb.gmra.mxu1 %vm104_vm0, %v366_v51 }
 0x76a   :  { %v379_v54 = vpop.f32.mrf.mxu1 }
 0x76b   :  { %v383_v55 = vadd.f32 %v379_v54, %v134_v53 }
 0x76d   :  { %1092 = vtanh.f32 %v383_v55  ;;  %v1003_v58 = vmul.f32 -1.442695, %v383_v55 }
 0x76f   :  { %1094 = vpow2.f32 %v1003_v58 }
 0x772   :  { %v381_v56 = vpop.f32.mrf.mxu1 }
 0x773   :  { %v1093_v57 = vpop.eup %1092 }
 0x774   :  { %406 = vrot.lane.b32.xlu0 %v1093_v57, %s1170_s21 }
 0x775   :  { %v1095_v59 = vpop.eup %1094 }
 0x776   :  { %v387_v60 = vadd.f32 1.0, %v1095_v59 }
 0x778   :  { %1096 = vrcp.f32 %v387_v60  ;;  %v399_v5 = vand.u32 2147483648, %v387_v60  ;;  %vm393_vm7 = vweird.f32 %v387_v60  ;;  %v397_v7 = vand.u32 2147483647, %v387_v60 }
 0x77a   :  { %v400_v9 = vor.u32 1.1754944e-38, %v399_v5  ;;  %vm398_vm9 = vcmp.eq.f32.partialorder %v397_v7, 8.507059e+37  ;;  %v558_v5 = vsel %vm557_vm1, 1, %v1169_v3 }
 0x77c   :  { %424 = vperm.xlu0 %1064, %v422_v61  }
 0x77e   :  { %v1097_v63 = vpop.eup %1096 }
 0x77f   :  { %v389_v0 = vmul.f32 %v1097_v63, %v387_v60  ;;  %vm394_vm6 = vweird.f32 %v1097_v63 }
 0x780   :  { %vm395_vm8 = vmor %vm393_vm7, %vm394_vm6  ;;  %vm625_vm7 = vcmp.gt.s32.totalorder %v1298_v32, 6 }
 0x781   :  { %v390_v1 = vsub.f32 1.0, %v389_v0 }
 0x783   :  { %v391_v2 = vmul.f32 %v1097_v63, %v390_v1 }
 0x784   :  { %492 = vperm.xlu0 %1064, %v490_v62   ;;  %v138_v62 = vpop.f32.mrf.mxu0 }
 0x785   :  { %v392_v4 = vadd.f32 %v1097_v63, %v391_v2 }
 0x787   :  { %v396_v8 = vsel %vm395_vm8, %v1097_v63, %v392_v4  ;;  %v139_v63 = vadd.f32 %v1290_v6, %v138_v62 }
 0x788   :  { %v401_v11 = vsel %vm398_vm9, %v400_v9, %v396_v8 }
 0x789   :  { %v404_v14 = vmul.f32 %v401_v11, %v359_v13 }
 0x7e6   :  { %v407_v10 = vpop.permute.xlu0 %406 }
 0x7e7   :  { %v409_v12 = vmul.f32 %v407_v10, %v401_v11 }
 0x7e9   :  { %411 = vrot.lane.b32.xlu1 %v409_v12, %s1171_s5 }
 0x7ee   :  { %v425_v19 = vpop.permute.xlu0 %424 }
 0x7ef   :  { %vm426_vm10 = vcmp.eq.s32.totalorder %v425_v19, 1 }
 0x7f6   :  { %v493_v54 = vpop.permute.xlu0 %492 }
 0x7f7   :  { %vm494_vm15 = vcmp.eq.s32.totalorder %v493_v54, 1 }
 0x85b   :  { %v412_v15 = vpop.permute.xlu1 %411 }
 0x85c   :  { %v414_v16 = vadd.f32 %v412_v15, %v404_v14 }
 0x85e   :  { %1098 = vtanh.f32 %v414_v16  ;;  %v427_v49 = vsel %vm426_vm10, %v414_v16, %v359_v13 }
 0x864   :  { %v1099_v17 = vpop.eup %1098 }
 0x865   :  { %417 = vrot.lane.b32.xlu2 %v1099_v17, %s1170_s21 }
 0x8bf   :  { %v418_v20 = vpop.permute.xlu2 %417 }
 0x8c0   :  { %v420_v21 = vmul.f32 %v418_v20, %v401_v11 }
 0x8c2   :  { %v429_v22 = vmax.f32 %v362_v50, %v420_v21  ;;  %v428_v23 = vsel %vm426_vm10, %v420_v21, %v360_v48 }
 0x8c3   :  { %v431_v24 = vpack.c.bf16 %v428_v23, %v428_v23 }
 0x8c4   :  { %v430_v25 = vsel %vm426_vm10, %v429_v22, %v362_v50 }
 0x8c5   :  { %433 = vrot.lane.b32.xlu1 %v431_v24, %s1171_s5 }
 0x937   :  { %v434_v26 = vpop.permute.xlu1 %433 }
 0x938   :  { %1004 = vmatmul.msk.bf16.vlgmr.msrb.gmra.mxu2 %vm104_vm0, %v434_v26 }
 0x9bb   :  { %v447_v29 = vpop.f32.mrf.mxu2 }
 0x9bc   :  { %v451_v30 = vadd.f32 %v447_v29, %v137_v28 }
 0x9be   :  { %1100 = vtanh.f32 %v451_v30  ;;  %v1005_v34 = vmul.f32 -1.442695, %v451_v30 }
 0x9c0   :  { %1102 = vpow2.f32 %v1005_v34 }
 0x9c3   :  { %v449_v31 = vpop.f32.mrf.mxu2 }
 0x9c4   :  { %v1101_v33 = vpop.eup %1100 }
 0x9c5   :  { %474 = vrot.lane.b32.xlu2 %v1101_v33, %s1170_s21 }
 0x9c6   :  { %v1103_v35 = vpop.eup %1102 }
 0x9c7   :  { %v455_v36 = vadd.f32 1.0, %v1103_v35 }
 0x9c9   :  { %1104 = vrcp.f32 %v455_v36  ;;  %v467_v42 = vand.u32 2147483648, %v455_v36  ;;  %vm461_vm12 = vweird.f32 %v455_v36  ;;  %v465_v43 = vand.u32 2147483647, %v455_v36 }
 0x9cb   :  { %v468_v45 = vor.u32 1.1754944e-38, %v467_v42  ;;  %vm466_vm14 = vcmp.eq.f32.partialorder %v465_v43, 8.507059e+37  ;;  %v626_v43 = vsel %vm625_vm7, 1, %v1169_v3 }
 0x9cf   :  { %v1105_v37 = vpop.eup %1104 }
 0x9d0   :  { %v457_v38 = vmul.f32 %v1105_v37, %v455_v36  ;;  %vm462_vm11 = vweird.f32 %v1105_v37 }
 0x9d1   :  { %vm463_vm13 = vmor %vm461_vm12, %vm462_vm11 }
 0x9d2   :  { %v458_v39 = vsub.f32 1.0, %v457_v38 }
 0x9d4   :  { %v459_v40 = vmul.f32 %v1105_v37, %v458_v39 }
 0x9d6   :  { %v460_v41 = vadd.f32 %v1105_v37, %v459_v40 }
 0x9d8   :  { %v464_v44 = vsel %vm463_vm13, %v1105_v37, %v460_v41  ;;  %v141_v37 = vpop.f32.mrf.mxu0  ;;  %vm693_vm13 = vcmp.gt.s32.totalorder %v1298_v32, 7 }
 0x9d9   :  { %v469_v47 = vsel %vm466_vm14, %v468_v45, %v464_v44  ;;  %v142_v38 = vadd.f32 %v1290_v6, %v141_v37 }
 0x9da   :  { %v472_v50 = vmul.f32 %v469_v47, %v427_v49 }
 0xa1f   :  { %v475_v46 = vpop.permute.xlu2 %474 }
 0xa20   :  { %v477_v48 = vmul.f32 %v475_v46, %v469_v47 }
 0xa22   :  { %479 = vrot.lane.b32.xlu1 %v477_v48, %s1171_s5 }
 0xa94   :  { %v480_v51 = vpop.permute.xlu1 %479 }
 0xa95   :  { %v482_v52 = vadd.f32 %v480_v51, %v472_v50 }
 0xa97   :  { %1106 = vtanh.f32 %v482_v52  ;;  %v495_v22 = vsel %vm494_vm15, %v482_v52, %v427_v49 }
 0xa9d   :  { %v1107_v53 = vpop.eup %1106 }
 0xa9e   :  { %485 = vrot.lane.b32.xlu2 %v1107_v53, %s1170_s21 }
 0xaf8   :  { %v486_v55 = vpop.permute.xlu2 %485 }
 0xaf9   :  { %v488_v56 = vmul.f32 %v486_v55, %v469_v47 }
 0xafb   :  { %v497_v57 = vmax.f32 %v430_v25, %v488_v56  ;;  %v496_v58 = vsel %vm494_vm15, %v488_v56, %v428_v23 }
 0xafc   :  { %v499_v59 = vpack.c.bf16 %v496_v58, %v496_v58 }
 0xafd   :  { %v498_v60 = vsel %vm494_vm15, %v497_v57, %v430_v25 }
 0xafe   :  { %501 = vrot.lane.b32.xlu1 %v499_v59, %s1171_s5 }
 0xb70   :  { %v502_v61 = vpop.permute.xlu1 %501 }
 0xb71   :  { %1006 = vmatmul.msk.bf16.vlgmr.msrb.gmra.mxu3 %vm104_vm0, %v502_v61 }
 0xbf4   :  { %v515_v0 = vpop.f32.mrf.mxu3 }
 0xbf5   :  { %v519_v1 = vadd.f32 %v515_v0, %v139_v63 }
 0xbf7   :  { %1108 = vtanh.f32 %v519_v1  ;;  %v1007_v7 = vmul.f32 -1.442695, %v519_v1 }
 0xbf9   :  { %1110 = vpow2.f32 %v1007_v7 }
 0xbfc   :  { %v517_v2 = vpop.f32.mrf.mxu3 }
 0xbfd   :  { %v1109_v4 = vpop.eup %1108 }
 0xbfe   :  { %542 = vrot.lane.b32.xlu2 %v1109_v4, %s1170_s21 }
 0xbff   :  { %v1111_v8 = vpop.eup %1110 }
 0xc00   :  { %v523_v9 = vadd.f32 1.0, %v1111_v8 }
 0xc02   :  { %1112 = vrcp.f32 %v523_v9  ;;  %v535_v15 = vand.u32 2147483648, %v523_v9  ;;  %vm529_vm3 = vweird.f32 %v523_v9  ;;  %v533_v16 = vand.u32 2147483647, %v523_v9 }
 0xc04   :  { %v536_v18 = vor.u32 1.1754944e-38, %v535_v15  ;;  %vm534_vm5 = vcmp.eq.f32.partialorder %v533_v16, 8.507059e+37  ;;  %v695_v16 = vsel %vm693_vm13, 1, %v1169_v3 }
 0xc06   :  { %560 = vperm.xlu2 %1063, %v558_v5  }
 0xc08   :  { %v1113_v10 = vpop.eup %1112 }
 0xc09   :  { %v525_v11 = vmul.f32 %v1113_v10, %v523_v9  ;;  %vm530_vm2 = vweird.f32 %v1113_v10 }
 0xc0a   :  { %vm531_vm4 = vmor %vm529_vm3, %vm530_vm2 }
 0xc0b   :  { %v526_v12 = vsub.f32 1.0, %v525_v11 }
 0xc0d   :  { %v527_v13 = vmul.f32 %v1113_v10, %v526_v12 }
 0xc0f   :  { %v528_v14 = vadd.f32 %v1113_v10, %v527_v13 }
 0xc11   :  { %v532_v17 = vsel %vm531_vm4, %v1113_v10, %v528_v14  ;;  %v143_v10 = vpop.f32.mrf.mxu0  ;;  %vm810_vm4 = vcmask 7168  }
 0xc12   :  { %v537_v20 = vsel %vm534_vm5, %v536_v18, %v532_v17  ;;  %v144_v11 = vadd.f32 %v1290_v6, %v143_v10  ;;  %vm779_vm5 = vcmask 15360  }
 0xc13   :  { %v540_v23 = vmul.f32 %v537_v20, %v495_v22 }
 0xc58   :  { %v543_v19 = vpop.permute.xlu2 %542 }
 0xc59   :  { %v545_v21 = vmul.f32 %v543_v19, %v537_v20 }
 0xc5b   :  { %547 = vrot.lane.b32.xlu0 %v545_v21, %s1171_s5 }
 0xc60   :  { %v561_v28 = vpop.permute.xlu2 %560 }
 0xc61   :  { %vm562_vm6 = vcmp.eq.s32.totalorder %v561_v28, 1 }
 0xccd   :  { %v548_v24 = vpop.permute.xlu0 %547 }
 0xcce   :  { %v550_v25 = vadd.f32 %v548_v24, %v540_v23 }
 0xcd0   :  { %1114 = vtanh.f32 %v550_v25  ;;  %v563_v59 = vsel %vm562_vm6, %v550_v25, %v495_v22 }
 0xcd6   :  { %v1115_v26 = vpop.eup %1114 }
 0xcd7   :  { %553 = vrot.lane.b32.xlu1 %v1115_v26, %s1170_s21 }
 0xd49   :  { %v554_v29 = vpop.permute.xlu1 %553 }
 0xd4a   :  { %v556_v30 = vmul.f32 %v554_v29, %v537_v20 }
 0xd4c   :  { %v565_v31 = vmax.f32 %v498_v60, %v556_v30  ;;  %v564_v33 = vsel %vm562_vm6, %v556_v30, %v496_v58 }
 0xd4d   :  { %v567_v34 = vpack.c.bf16 %v564_v33, %v564_v33 }
 0xd4e   :  { %v566_v35 = vsel %vm562_vm6, %v565_v31, %v498_v60 }
 0xd4f   :  { %569 = vrot.lane.b32.xlu0 %v567_v34, %s1171_s5 }
 0xdc1   :  { %v570_v36 = vpop.permute.xlu0 %569 }
 0xdc2   :  { %1008 = vmatmul.msk.bf16.vlgmr.msra.gmra.mxu1 %vm104_vm0, %v570_v36  ;;  %v1040_v36 = vld [vmem:[%s1458_s6] sm:$0xff] }
 0xe3f   :  { %v583_v39 = vpop.f32.mrf.mxu1 }
 0xe40   :  { %v587_v40 = vadd.f32 %v583_v39, %v142_v38 }
 0xe42   :  { %1116 = vtanh.f32 %v587_v40  ;;  %v1009_v44 = vmul.f32 -1.442695, %v587_v40 }
 0xe44   :  { %1118 = vpow2.f32 %v1009_v44 }
 0xe47   :  { %v585_v41 = vpop.f32.mrf.mxu1 }
 0xe48   :  { %v1117_v42 = vpop.eup %1116 }
 0xe49   :  { %610 = vrot.lane.b32.xlu1 %v1117_v42, %s1170_s21 }
 0xe4a   :  { %v1119_v45 = vpop.eup %1118 }
 0xe4b   :  { %v591_v46 = vadd.f32 1.0, %v1119_v45  ;;  %v1042_v45 = vld [vmem:[%s1460_s8] sm:$0xff] }
 0xe4d   :  { %1120 = vrcp.f32 %v591_v46  ;;  %v603_v52 = vand.u32 2147483648, %v591_v46  ;;  %vm597_vm9 = vweird.f32 %v591_v46  ;;  %v601_v53 = vand.u32 2147483647, %v591_v46 }
 0xe4f   :  { %v604_v55 = vor.u32 1.1754944e-38, %v603_v52  ;;  %vm602_vm11 = vcmp.eq.f32.partialorder %v601_v53, 8.507059e+37  ;;  %v806_v52 = vld [vmem:[%s1454_s2] sm:$0xff]  ;;  %s1172_s2 = smov 1  }
 0xe50   :  { %v811_v53 = vsel %vm810_vm4, %v806_v52, 0.0 }
 0xe51   :  { %628 = vperm.xlu1 %1062, %v626_v43   ;;  %v1043_v43 = vld [vmem:[%s1460_s8 + $0x8] sm:$0xff] }
 0xe52   :  { %772 = vmatpush.bf16.msrb.mxu1 %v1043_v43 }
 0xe53   :  { %v1121_v47 = vpop.eup %1120 }
 0xe54   :  { %v593_v48 = vmul.f32 %v1121_v47, %v591_v46  ;;  %vm598_vm8 = vweird.f32 %v1121_v47  ;;  %v1066_v46 = vld [vmem:[%s1459_s7] ss:$0 sm:$0xff] }
 0xe55   :  { %vm599_vm10 = vmor %vm597_vm9, %vm598_vm8 }
 0xe56   :  { %v594_v49 = vsub.f32 1.0, %v593_v48  ;;  %773 = vmatpush.bf16.msrb.mxu1 %v1042_v45 }
 0xe58   :  { %v595_v50 = vmul.f32 %v1121_v47, %v594_v49 }
 0xe5a   :  { %v596_v51 = vadd.f32 %v1121_v47, %v595_v50 }
 0xe5c   :  { %v600_v54 = vsel %vm599_vm10, %v1121_v47, %v596_v51 }
 0xe5d   :  { %v605_v57 = vsel %vm602_vm11, %v604_v55, %v600_v54  ;;  %v1067_v54 = vld [vmem:[%s1461_s9] ss:$0 sm:$0xff] }
 0xe5e   :  { %v608_v60 = vmul.f32 %v605_v57, %v563_v59 }
 0xebb   :  { %v611_v56 = vpop.permute.xlu1 %610 }
 0xebc   :  { %v613_v58 = vmul.f32 %v611_v56, %v605_v57 }
 0xebe   :  { %615 = vrot.lane.b32.xlu2 %v613_v58, %s1171_s5 }
 0xec3   :  { %v629_v0 = vpop.permute.xlu1 %628 }
 0xec4   :  { %vm630_vm12 = vcmp.eq.s32.totalorder %v629_v0, 1 }
 0xf18   :  { %v616_v61 = vpop.permute.xlu2 %615 }
 0xf19   :  { %v618_v62 = vadd.f32 %v616_v61, %v608_v60 }
 0xf1b   :  { %1122 = vtanh.f32 %v618_v62  ;;  %v631_v29 = vsel %vm630_vm12, %v618_v62, %v563_v59  ;;  %v830_v59 = vsub.f32 1.0, %v806_v52  ;;  %v1173_v62 = vmov 8.0  }
 0xf21   :  { %v1123_v63 = vpop.eup %1122 }
 0xf22   :  { %621 = vrot.lane.b32.xlu0 %v1123_v63, %s1170_s21 }
 0xf94   :  { %v622_v1 = vpop.permute.xlu0 %621 }
 0xf95   :  { %v624_v2 = vmul.f32 %v622_v1, %v605_v57 }
 0xf97   :  { %v633_v4 = vmax.f32 %v566_v35, %v624_v2  ;;  %v632_v5 = vsel %vm630_vm12, %v624_v2, %v564_v33 }
 0xf98   :  { %v635_v7 = vpack.c.bf16 %v632_v5, %v632_v5 }
 0xf99   :  { %v634_v8 = vsel %vm630_vm12, %v633_v4, %v566_v35  ;;  %v1041_v35 = vld [vmem:[%s1458_s6 + $0x8] sm:$0xff] }
 0xf9a   :  { %637 = vrot.lane.b32.xlu2 %v635_v7, %s1171_s5  ;;  %738 = vmatpush.bf16.msra.mxu3 %v1041_v35 }
 0xf9e   :  { %739 = vmatpush.bf16.msra.mxu3 %v1040_v36 }
 0xff4   :  { %v638_v9 = vpop.permute.xlu2 %637 }
 0xff5   :  { %1010 = vmatmul.msk.bf16.vlgmr.msra.gmra.mxu2 %vm104_vm0, %v638_v9 }
0x1078   :  { %v651_v12 = vpop.f32.mrf.mxu2 }
0x1079   :  { %v655_v13 = vadd.f32 %v651_v12, %v144_v11 }
0x107b   :  { %1124 = vtanh.f32 %v655_v13  ;;  %v1011_v17 = vmul.f32 -1.442695, %v655_v13 }
0x107d   :  { %1126 = vpow2.f32 %v1011_v17 }
0x1080   :  { %v653_v14 = vpop.f32.mrf.mxu2 }
0x1081   :  { %v1125_v15 = vpop.eup %1124 }
0x1082   :  { %678 = vrot.lane.b32.xlu0 %v1125_v15, %s1170_s21 }
0x1083   :  { %v1127_v18 = vpop.eup %1126 }
0x1084   :  { %v659_v19 = vadd.f32 1.0, %v1127_v18 }
0x1086   :  { %1128 = vrcp.f32 %v659_v19  ;;  %v671_v24 = vand.u32 2147483648, %v659_v19  ;;  %vm665_vm15 = vweird.f32 %v659_v19  ;;  %v669_v25 = vand.u32 2147483647, %v659_v19 }
0x1088   :  { %v672_v32 = vor.u32 1.1754944e-38, %v671_v24  ;;  %vm670_vm2 = vcmp.eq.f32.partialorder %v669_v25, 8.507059e+37 }
0x108a   :  { %697 = vperm.xlu0 %1064, %v695_v16  }
0x108c   :  { %v1129_v20 = vpop.eup %1128 }
0x108d   :  { %v661_v21 = vmul.f32 %v1129_v20, %v659_v19  ;;  %vm666_vm14 = vweird.f32 %v1129_v20 }
0x108e   :  { %vm667_vm1 = vmor %vm665_vm15, %vm666_vm14 }
0x108f   :  { %v662_v6 = vsub.f32 1.0, %v661_v21 }
0x1091   :  { %v663_v22 = vmul.f32 %v1129_v20, %v662_v6 }
0x1093   :  { %v664_v23 = vadd.f32 %v1129_v20, %v663_v22 }
0x1095   :  { %v668_v26 = vsel %vm667_vm1, %v1129_v20, %v664_v23 }
0x1096   :  { %v673_v27 = vsel %vm670_vm2, %v672_v32, %v668_v26 }
0x1097   :  { %v676_v30 = vmul.f32 %v673_v27, %v631_v29 }
0x10b4   :  { %812 = vadd.xlane.f32.xlu0 %v811_v53 }
0x10c8   :  { %868 = vrot.lane.b32.xlu0 %v830_v59, %s1172_s2 }
0x10f4   :  { %v679_v3 = vpop.permute.xlu0 %678 }
0x10f5   :  { %v681_v28 = vmul.f32 %v679_v3, %v673_v27 }
0x10f7   :  { %683 = vrot.lane.b32.xlu1 %v681_v28, %s1171_s5 }
0x10fc   :  { %v698_v38 = vpop.permute.xlu0 %697 }
0x10fd   :  { %vm699_vm3 = vcmp.eq.s32.totalorder %v698_v38, 1 }
0x1127   :  { %v813_v60 = vpop.xlane.xlu0 %812 }
0x1128   :  { %v814_v61 = vrot.slane %v813_v60, 4 }
0x112a   :  { %v815_v63 = vadd.f32 %v814_v61, %v813_v60 }
0x112c   :  { %v816_v0 = vrot.slane %v815_v63, 2 }
0x112e   :  { %v817_v2 = vadd.f32 %v816_v0, %v815_v63 }
0x1130   :  { %v818_v5 = vrot.slane %v817_v2, 1 }
0x113a   :  { %v869_v29 = vpop.permute.xlu0 %868 }
0x1169   :  { %v684_v31 = vpop.permute.xlu1 %683 }
0x116a   :  { %v686_v33 = vadd.f32 %v684_v31, %v676_v30 }
0x116c   :  { %1130 = vtanh.f32 %v686_v33 }
0x1172   :  { %v1131_v34 = vpop.eup %1130 }
0x1173   :  { %689 = vrot.lane.b32.xlu2 %v1131_v34, %s1170_s21  ;;  %s807_s21 = sld [smem:[#allocation2]] }
0x1179   :  { %v832_v3 = vstv %s807_s21 }
0x11cd   :  { %v690_v37 = vpop.permute.xlu2 %689 }
0x11ce   :  { %v692_v39 = vmul.f32 %v690_v37, %v673_v27 }
0x11d0   :  { %v694_v40 = vmax.f32 %v634_v8, %v692_v39 }
0x11d2   :  { %v700_v41 = vsel %vm699_vm3, %v694_v40, %v634_v8  ;;  %v819_v8 = vadd.f32 %v818_v5, %v817_v2 }
0x11d3   :  { %v709_v42 = vpack.c.bf16 %v700_v41, %v700_v41 }
0x11d4   :  { %1044 = vpush %v819_v8 }
0x11d5   :  { %715 = vrot.lane.b32.xlu1 %v709_v42, %s1171_s5 }
0x1205   :  { %s1045_s9 = spop %1044 }
0x1247   :  { %v716_v44 = vpop.permute.xlu1 %715 }
0x1248   :  { %1020 = vmatmul.msk.bf16.vlgmr.msra.gmra.mxu3 %vm104_vm0, %v716_v44 }
0x12cb   :  { %v741_v47 = vpop.f32.mrf.mxu3 }
0x12cc   :  { %v742_v48 = vadd.f32 %v1066_v46, %v741_v47 }
0x12ce   :  { %1132 = vtanh.f32 %v742_v48 }
0x12cf   :  { %1134 = vrcp.f32 %v1173_v62 }
0x12d3   :  { %v743_v49 = vpop.f32.mrf.mxu3 }
0x12d4   :  { %v1133_v50 = vpop.eup %1132 }
0x12d5   :  { %v746_v51 = vpack.c.bf16 %v1133_v50, %v1133_v50  ;;  %v1135_v1 = vpop.eup %1134 }
0x12d6   :  { %v822_v4 = vmul.f32 8.0, %v1135_v1 }
0x12d7   :  { %1029 = vmatmul.msk.bf16.vlgmr.msrb.gmra.mxu1 %vm104_vm0, %v746_v51  ;;  %vm826_vm0 = vweird.f32 %v1135_v1 }
0x12d8   :  { %v823_v7 = vsub.f32 1.0, %v822_v4 }
0x12da   :  { %v824_v9 = vmul.f32 %v1135_v1, %v823_v7 }
0x12dc   :  { %v825_v10 = vadd.f32 %v1135_v1, %v824_v9 }
0x12de   :  { %v827_v11 = vsel %vm826_vm0, %v1135_v1, %v825_v10 }
0x12df   :  { %1046 = vpush %v827_v11 }
0x1310   :  { %s1425_s5 = spop %1046 }
0x1311   :  { %s1428_s22 = smul.f32 %s1425_s5, %s1045_s9  ;;  %s1175_s9 = smov [#allocation5]  }
0x1313   :  { %s1431_s23 = ssub.f32 1.0, %s1428_s22  ;;  %v899_v28 = vstv %s1428_s22 }
0x1315   :  { %v902_v30 = vstv %s1431_s23  ;;  %s898_s26 = smul.f32 %s1431_s23, %s1428_s22 }
0x1354   :  { %v775_v55 = vpop.f32.mrf.mxu1 }
0x1355   :  { %v776_v56 = vadd.f32 %v1067_v54, %v775_v55 }
0x1357   :  { %v781_v57 = vsel %vm779_vm5, %v776_v56, -inf  ;;  %780 = vst.msk [vmem:[%s1463_s11] sm:$0xff] %vm779_vm5, %v776_v56  ;;  %s1030_s11 = sld [smem:[#allocation2 + $0x1]] }
0x1358   :  { %782 = vmax.xlane.f32.xlu2 %v781_v57 }
0x135c   :  { %v777_v58 = vpop.f32.mrf.mxu1 }
0x135d   :  { %v864_v32 = vstv %s1030_s11 }
0x1370   :  { %836 = vrot.lane.b32.xlu2 %v806_v52, %s1172_s2 }
0x13cb   :  { %v783_v12 = vpop.xlane.xlu2 %782 }
0x13cc   :  { %v784_v13 = vsub.f32 %v776_v56, %v783_v12 }
0x13ce   :  { %v785_v14 = vmul.f32 1.442695, %v784_v13 }
0x13d0   :  { %1136 = vpow2.f32 %v785_v14 }
0x13d3   :  { %v837_v31 = vpop.permute.xlu2 %836 }
0x13d6   :  { %v1137_v15 = vpop.eup %1136 }
0x13d7   :  { %v787_v16 = vsel %vm779_vm5, %v1137_v15, 0.0 }
0x13d8   :  { %788 = vadd.xlane.f32.xlu1 %v787_v16 }
0x144b   :  { %v789_v17 = vpop.xlane.xlu1 %788 }
0x144c   :  { %1138 = vrcp.f32 %v789_v17  ;;  %v801_v21 = vand.u32 2147483648, %v789_v17  ;;  %v799_v22 = vand.u32 2147483647, %v789_v17  ;;  %vm795_vm7 = vweird.f32 %v789_v17 }
0x144e   :  { %v802_v24 = vor.u32 1.1754944e-38, %v801_v21  ;;  %vm800_vm9 = vcmp.eq.f32.partialorder %v799_v22, 8.507059e+37 }
0x1452   :  { %v1139_v18 = vpop.eup %1138 }
0x1453   :  { %v791_v19 = vmul.f32 %v1139_v18, %v789_v17  ;;  %vm796_vm6 = vweird.f32 %v1139_v18 }
0x1454   :  { %vm797_vm8 = vmor %vm795_vm7, %vm796_vm6 }
0x1455   :  { %v792_v20 = vsub.f32 1.0, %v791_v19 }
0x1457   :  { %v793_v6 = vmul.f32 %v1139_v18, %v792_v20 }
0x1459   :  { %v794_v23 = vadd.f32 %v1139_v18, %v793_v6 }
0x145b   :  { %v798_v25 = vsel %vm797_vm8, %v1139_v18, %v794_v23 }
0x145c   :  { %v803_v26 = vsel %vm800_vm9, %v802_v24, %v798_v25 }
0x145d   :  { %v804_v27 = vmul.f32 %v1137_v15, %v803_v26 }
0x145f   :  { %805 = vst.msk [vmem:[%s1464_s12] sm:$0xff] %vm779_vm5, %v804_v27  ;;  %v865_v33 = vsub.f32 %v804_v27, %v864_v32  ;;  %v900_v34 = vmul.f32 %v899_v28, %v804_v27  ;;  %v833_v35 = vsub.f32 %v804_v27, %v832_v3  ;;  %v903_v36 = vmul.f32 %v902_v30, %v804_v27  ;;  %s1031_s12 = sld [smem:[#allocation2 + $0x2]] }
0x1461   :  { %v866_v37 = vmul.f32 %v865_v33, %v865_v33  ;;  %v901_v38 = vmul.f32 %v900_v34, %v869_v29  ;;  %v834_v39 = vmul.f32 %v833_v35, %v833_v35  ;;  %v904_v40 = vmul.f32 %v903_v36, %v837_v31 }
0x1463   :  { %v871_v41 = vmul.f32 %v869_v29, %v866_v37  ;;  %v839_v42 = vmul.f32 %v837_v31, %v834_v39  ;;  %v905_v43 = vsub.f32 %v901_v38, %v904_v40 }
0x1465   :  { %873 = vrot.lane.b32.xlu2 %v871_v41, %s1174_s25  ;;  %841 = vrot.lane.b32.xlu1 %v839_v42, %s1174_s25  ;;  %s897_s28 = smul.f32 2.0, %s1031_s12 }
0x1466   :  { %907 = vrot.lane.b32.xlu0 %v905_v43, %s1174_s25  ;;  %s932_s18 = smul.f32 %s1031_s12, %s1031_s12 }
0x1468   :  { %s933_s20 = smul.f32 %s932_s18, %s898_s26 }
0x14bf   :  { %v874_v44 = vpop.permute.xlu2 %873 }
0x14c0   :  { %v876_v45 = vsel %vm810_vm4, %v874_v44, 0.0 }
0x14c1   :  { %877 = vadd.xlane.f32.xlu1 %v876_v45 }
0x14d7   :  { %v842_v46 = vpop.permute.xlu1 %841 }
0x14d8   :  { %v908_v47 = vpop.permute.xlu0 %907  ;;  %v844_v48 = vsel %vm810_vm4, %v842_v46, 0.0 }
0x14d9   :  { %845 = vadd.xlane.f32.xlu2 %v844_v48  ;;  %v910_v49 = vsel %vm810_vm4, %v908_v47, 0.0 }
0x14da   :  { %911 = vadd.xlane.f32.xlu0 %v910_v49 }
0x1534   :  { %v878_v50 = vpop.xlane.xlu1 %877 }
0x1535   :  { %v879_v51 = vrot.slane %v878_v50, 4 }
0x1537   :  { %v880_v52 = vadd.f32 %v879_v51, %v878_v50 }
0x1539   :  { %v881_v53 = vrot.slane %v880_v52, 2 }
0x153b   :  { %v882_v59 = vadd.f32 %v881_v53, %v880_v52 }
0x153d   :  { %v883_v1 = vrot.slane %v882_v59, 1 }
0x153f   :  { %v884_v7 = vadd.f32 %v883_v1, %v882_v59 }
0x154c   :  { %v846_v54 = vpop.xlane.xlu2 %845 }
0x154d   :  { %v912_v55 = vpop.xlane.xlu0 %911  ;;  %v847_v56 = vrot.slane %v846_v54, 4 }
0x154e   :  { %v913_v57 = vrot.slane %v912_v55, 4 }
0x154f   :  { %v848_v58 = vadd.f32 %v847_v56, %v846_v54 }
0x1550   :  { %v914_v60 = vadd.f32 %v913_v57, %v912_v55 }
0x1551   :  { %v849_v61 = vrot.slane %v848_v58, 2 }
0x1552   :  { %v915_v62 = vrot.slane %v914_v60, 2 }
0x1553   :  { %v850_v63 = vadd.f32 %v849_v61, %v848_v58 }
0x1554   :  { %v916_v0 = vadd.f32 %v915_v62, %v914_v60 }
0x1555   :  { %v851_v2 = vrot.slane %v850_v63, 1 }
0x1556   :  { %v917_v4 = vrot.slane %v916_v0, 1 }
0x1557   :  { %v852_v5 = vadd.f32 %v851_v2, %v850_v63 }
0x1558   :  { %v918_v8 = vadd.f32 %v917_v4, %v916_v0 }
0x1559   :  { %1048 = vpush %v852_v5 }
0x155a   :  { %1050 = vpush %v884_v7 }
0x155b   :  { %1052 = vpush %v918_v8 }
0x158a   :  { %s1049_s27 = spop %1048 }
0x158b   :  { %s862_s0 = smul.f32 %s1049_s27, %s1425_s5  ;;  %s1051_s29 = spop %1050 }
0x158c   :  { %s894_s30 = smul.f32 %s1051_s29, %s1425_s5  ;;  %s1053_s14 = spop %1052 }
0x158d   :  { %s863_s15 = smul.f32 %s862_s0, %s1431_s23 }
0x158e   :  { %s895_s16 = smul.f32 %s894_s30, %s1428_s22 }
0x158f   :  { %s928_s17 = smul.f32 %s1053_s14, %s1425_s5 }
0x1590   :  { %s896_s6 = sadd.f32 %s895_s16, %s863_s15 }
0x1591   :  { %s929_s10 = sadd.f32 %s928_s17, %s898_s26 }
0x1593   :  { %s930_s3 = smul.f32 %s929_s10, %s897_s28 }
0x1595   :  { %s931_s7 = sadd.f32 %s930_s3, %s896_s6 }
0x1597   :  { %s934_s2 = ssub.f32 %s931_s7, %s933_s20 }
0x1599   :  { %936 = sst [smem:[#allocation5]] %s934_s2 }
0x159a   :  { %949 = dma.smem_to_hbm %s1175_s9, 16, %s947_s4, [#allocation3]  }
0x159b   :  { %1166 = dma.done.wait [#allocation3], 16  }
0x159c   :  { %1167 = vsyncadd [#allocation3], 4294967280 }
0x159d   :  { %958 = sfence }
0x159e   :  { %959 = vsyncpa [#allocation3], 1 }
0x159f   :  { %960 = vsyncpa [#allocation4], 1 }

</bundles_post_ra>
